<compile_context>
chip_gen: v7x
topology: tpu7x:2x2x1
jax: 0.10.0
libtpu: 0.0.40
codegen_flags: <defaults>
</compile_context>

<pallas_src>
import functools
import math

import jax
import jax.numpy as jnp
from jax.experimental import pallas as pl
from jax.experimental.pallas import tpu as pltpu


OUT_LANES = 128     # lane-dense packed output width (one vreg of lanes)
GATE = 128          # one full 128-lane slot per GRU gate (z | r | n)
LOGIT_OFF = 0       # lanes [0, 2)          -> logits
DIST_OFF = 2        # lanes [2, 2+K)        -> dist2img
# logp_off = 2 + K  # lanes [2+K, 4+K)      -> log_softmax(logits)


# ---------------------------------------------------------------------------
# Fused Pallas kernel: GRU encoder + Discriminator.predict() + log_softmax
# ---------------------------------------------------------------------------
def _discriminator_kernel(fts_ref, xseq_ref, lens_ref,
                          w_all_x_ref, b_all_x_ref, u_all_h_ref,
                          w_comb_ref, w_pool_place_ref, w_ff_place_ref,
                          b_ff_wide_ref, out_ref, *, dim_hidden, logp_off):
    B = fts_ref.shape[0]                       # padded batch (multiple of 8)
    max_step = xseq_ref.shape[0] // B
    KD = w_pool_place_ref.shape[0]             # num_kernel * dim_kernel

    # --- GRU encoder -------------------------------------------------------
    # All timestep input projections in ONE MXU pass.  Each gate occupies its
    # own 128-lane slot, so the per-step gate slices are whole-vreg views.
    xproj = (jnp.dot(xseq_ref[...], w_all_x_ref[...],
                     preferred_element_type=jnp.float32)
             + b_all_x_ref[...])               # (max_step*B, 3*GATE)
    u_all = u_all_h_ref[...]                   # (GATE, 3*GATE)
    lens = lens_ref[...]                       # (B, 1) int32

    # Hidden state carried in a full 128-lane slot.  Column `dim_hidden`
    # holds a constant 1.0 that multiplies the b_hn row of u_all_h (folding
    # b_hn into the hidden matmul).  b_all_x puts +60 on that column of the z
    # gate so z == 1.0 there and the update preserves the constant column.
    lane = jax.lax.broadcasted_iota(jnp.int32, (B, GATE), 1)
    h = jnp.where(lane == dim_hidden, 1.0, 0.0).astype(jnp.float32)

    for t in range(max_step):                  # small static trip count -> unrolled
        xzrn = xproj[t * B:(t + 1) * B, :]     # (B, 3*GATE)  static sublane slice
        hu = jnp.dot(h, u_all, preferred_element_type=jnp.float32)
        z = jax.nn.sigmoid(xzrn[:, 0:GATE] + hu[:, 0:GATE])
        r = jax.nn.sigmoid(xzrn[:, GATE:2 * GATE] + hu[:, GATE:2 * GATE])
        n = jnp.tanh(xzrn[:, 2 * GATE:3 * GATE] + r * hu[:, 2 * GATE:3 * GATE])
        h_new = (1.0 - z) * n + z * h
        h = jnp.where(lens > t, h_new, h)      # keep last valid hidden state

    # --- Discriminator.predict() -------------------------------------------
    # (dropout/noise == identity, see TODO above)
    # img and sentence projections fused into one block-diagonal MXU pass;
    # both result halves land on 128-lane aligned boundaries.
    x_comb = jnp.concatenate([fts_ref[...], h], axis=1)     # (B, 128 + GATE)
    proj = jnp.dot(x_comb, w_comb_ref[...], preferred_element_type=jnp.float32)
    prod = proj[:, 0:KD] * proj[:, KD:2 * KD]                # (B, KD)  VPU

    # pooling matmul places dist2img directly at lanes [DIST_OFF, DIST_OFF+K)
    dist_place = jnp.tanh(jnp.dot(prod, w_pool_place_ref[...],
                                  preferred_element_type=jnp.float32))
    # ff matmul places logits at lanes [0,2) and a copy at [logp_off, logp_off+2);
    # adding dist_place back keeps the dist lanes (ff weight is zero there).
    base = (jnp.dot(dist_place, w_ff_place_ref[...],
                    preferred_element_type=jnp.float32)
            + b_ff_wide_ref[...] + dist_place)               # (B, OUT_LANES)

    # 2-class log_softmax, subtracted only on the log_p lanes
    l0 = base[:, 0:1]
    l1 = base[:, 1:2]
    m01 = jnp.maximum(l0, l1)
    lse = m01 + jnp.log(jnp.exp(l0 - m01) + jnp.exp(l1 - m01))   # (B, 1)
    out_lane = jax.lax.broadcasted_iota(jnp.int32, base.shape, 1)
    logp_mask = jnp.logical_and(out_lane >= logp_off,
                                out_lane < logp_off + 2).astype(jnp.float32)

    # single unmasked full-vreg store of the packed (B, 128) output
    out_ref[...] = base - lse * logp_mask


# ---------------------------------------------------------------------------
# One-time weight packing (hoisted out of the per-call path)
# ---------------------------------------------------------------------------
def pack_params(params, num_kernel, dim_kernel):
    E, H = params["W_z"].shape
    dim_ft = params["w_img"].shape[0]
    KD = num_kernel * dim_kernel
    logp_off = DIST_OFF + num_kernel
    assert H + 1 <= GATE and dim_ft <= OUT_LANES
    assert logp_off + 2 <= OUT_LANES

    f32 = jnp.float32
    # GRU input projection: each gate in its own 128-lane slot
    w_all_x = jnp.zeros((E, 3 * GATE), f32)
    w_all_x = w_all_x.at[:, 0:H].set(params["W_z"])
    w_all_x = w_all_x.at[:, GATE:GATE + H].set(params["W_r"])
    w_all_x = w_all_x.at[:, 2 * GATE:2 * GATE + H].set(params["W_n"])

    b_all_x = jnp.zeros((1, 3 * GATE), f32)
    b_all_x = b_all_x.at[0, 0:H].set(params["b_z"])
    b_all_x = b_all_x.at[0, H].set(60.0)       # z==1 on the constant-ones column
    b_all_x = b_all_x.at[0, GATE:GATE + H].set(params["b_r"])
    b_all_x = b_all_x.at[0, 2 * GATE:2 * GATE + H].set(params["b_in"])

    # GRU hidden projection with b_hn folded in as the row the ones column hits
    u_all_h = jnp.zeros((GATE, 3 * GATE), f32)
    u_all_h = u_all_h.at[0:H, 0:H].set(params["U_z"])
    u_all_h = u_all_h.at[0:H, GATE:GATE + H].set(params["U_r"])
    u_all_h = u_all_h.at[0:H, 2 * GATE:2 * GATE + H].set(params["U_n"])
    u_all_h = u_all_h.at[H, 2 * GATE:2 * GATE + H].set(params["b_hn"])

    # fused img/sent projection: block-diagonal, 128-aligned halves
    F_PAD = OUT_LANES
    w_comb = jnp.zeros((F_PAD + GATE, 2 * KD), f32)
    w_comb = w_comb.at[0:dim_ft, 0:KD].set(params["w_img"])
    w_comb = w_comb.at[F_PAD:F_PAD + H, KD:2 * KD].set(params["w_sent"])

    # pooling matmul (block-diag ones / sqrt(D)) placed at the dist lanes
    pool = (jnp.kron(jnp.eye(num_kernel, dtype=f32),
                     jnp.ones((dim_kernel, 1), f32)) / math.sqrt(dim_kernel))
    w_pool_place = jnp.zeros((KD, OUT_LANES), f32)
    w_pool_place = w_pool_place.at[:, DIST_OFF:DIST_OFF + num_kernel].set(pool)

    # ff matmul placed at the logits lanes and (a copy) at the log_p lanes
    w_ff_place = jnp.zeros((OUT_LANES, OUT_LANES), f32)
    w_ff_place = w_ff_place.at[DIST_OFF:DIST_OFF + num_kernel,
                               LOGIT_OFF:LOGIT_OFF + 2].set(params["w_ff"])
    w_ff_place = w_ff_place.at[DIST_OFF:DIST_OFF + num_kernel,
                               logp_off:logp_off + 2].set(params["w_ff"])

    b_ff_wide = jnp.zeros((1, OUT_LANES), f32)
    b_ff_wide = b_ff_wide.at[0, LOGIT_OFF:LOGIT_OFF + 2].set(params["b_ff"])
    b_ff_wide = b_ff_wide.at[0, logp_off:logp_off + 2].set(params["b_ff"])

    return {"embedding": params["embedding"], "w_all_x": w_all_x,
            "b_all_x": b_all_x, "u_all_h": u_all_h, "w_comb": w_comb,
            "w_pool_place": w_pool_place, "w_ff_place": w_ff_place,
            "b_ff_wide": b_ff_wide}


# ---------------------------------------------------------------------------
# Wrapper: padding, embedding gather, pallas_call, unpacking
# ---------------------------------------------------------------------------
def discriminator_predict(fts, sents, lens, packed, *, num_kernel, dim_hidden):
    b, dim_ft = fts.shape
    max_step = sents.shape[0]
    dim_emb = packed["embedding"].shape[1]
    B_PAD = max(8, -(-b // 8) * 8)             # full sublane occupancy
    logp_off = DIST_OFF + num_kernel

    fts_p = jnp.zeros((B_PAD, OUT_LANES), jnp.float32).at[:b, :dim_ft].set(fts)
    lens_p = jnp.zeros((B_PAD, 1), jnp.int32).at[:b, 0].set(lens)

    # TODO(synk): embedding gather stays in JAX (no clean Pallas gather here).
    emb = packed["embedding"][sents]                       # (max_step, b, E)
    emb_p = jnp.zeros((max_step, B_PAD, dim_emb), jnp.float32).at[:, :b].set(emb)
    xseq = emb_p.reshape(max_step * B_PAD, dim_emb)

    operands = (fts_p, xseq, lens_p, packed["w_all_x"], packed["b_all_x"],
                packed["u_all_h"], packed["w_comb"], packed["w_pool_place"],
                packed["w_ff_place"], packed["b_ff_wide"])

    flops = 2 * (max_step * B_PAD * dim_emb * 3 * GATE        # xproj
                 + max_step * B_PAD * GATE * 3 * GATE         # recurrence
                 + B_PAD * (OUT_LANES + GATE) * packed["w_comb"].shape[1]
                 + B_PAD * packed["w_pool_place"].shape[0] * OUT_LANES
                 + B_PAD * OUT_LANES * OUT_LANES)
    transcendentals = max_step * B_PAD * 3 * GATE + B_PAD * OUT_LANES + 4 * B_PAD
    bytes_accessed = (sum(int(x.size) * x.dtype.itemsize for x in operands)
                      + B_PAD * OUT_LANES * 4)

    vmem = pltpu.MemorySpace.VMEM
    kernel = functools.partial(_discriminator_kernel,
                               dim_hidden=dim_hidden, logp_off=logp_off)
    packed_out = pl.pallas_call(
        kernel,
        out_shape=jax.ShapeDtypeStruct((B_PAD, OUT_LANES), jnp.float32),
        in_specs=[pl.BlockSpec(memory_space=vmem)] * len(operands),
        out_specs=pl.BlockSpec(memory_space=vmem),
        cost_estimate=pl.CostEstimate(flops=flops,
                                      transcendentals=transcendentals,
                                      bytes_accessed=bytes_accessed),
    )(*operands)

    logits = packed_out[:b, LOGIT_OFF:LOGIT_OFF + 2]
    dist2img = packed_out[:b, DIST_OFF:DIST_OFF + num_kernel]
    log_p = packed_out[:b, logp_off:logp_off + 2]
    return logits, dist2img, log_p


# ---------------------------------------------------------------------------
# Full forward (mode dispatch derived from the in-kernel log_softmax), jitted
# ---------------------------------------------------------------------------
@functools.partial(jax.jit, static_argnums=(0,),
                   static_argnames=("num_kernel", "dim_hidden"))
def discriminator_forward(mode, fts, sents, lens, packed, *, num_kernel,
                          dim_hidden, y=None):
    logits, dist2img, log_p = discriminator_predict(
        fts, sents, lens, packed, num_kernel=num_kernel, dim_hidden=dim_hidden)
    if mode == "trn":
        loss = -jnp.mean(jnp.take_along_axis(log_p, y[:, None], axis=-1))
        return loss, dist2img
    elif mode == "eval":
        return log_p[:, 1]
    else:
        return jnp.exp(log_p)            # softmax = exp(log_softmax)


# ---------------------------------------------------------------------------
# Deterministic parameter construction
# ---------------------------------------------------------------------------
def make_params(key, dim_ft, dim_hidden, dim_kernel, num_kernel,
                vocab_size, dim_emb):
    kd = dim_kernel * num_kernel
    ks = jax.random.split(key, 12)
    s = 0.05
    return {
        # discriminator weights (stored (in, out) so the kernel does x @ W)
        "w_img":  s * jax.random.normal(ks[0], (dim_ft, kd), jnp.float32),
        "w_sent": s * jax.random.normal(ks[1], (dim_hidden, kd), jnp.float32),
        "w_ff":   s * jax.random.normal(ks[2], (num_kernel, 2), jnp.float32),
        "b_ff":   jnp.zeros((2,), jnp.float32),
        # GRU encoder
        "embedding": s * jax.random.normal(ks[3], (vocab_size, dim_emb), jnp.float32),
        "W_z": s * jax.random.normal(ks[4], (dim_emb, dim_hidden), jnp.float32),
        "W_r": s * jax.random.normal(ks[5], (dim_emb, dim_hidden), jnp.float32),
        "W_n": s * jax.random.normal(ks[6], (dim_emb, dim_hidden), jnp.float32),
        "U_z": s * jax.random.normal(ks[7], (dim_hidden, dim_hidden), jnp.float32),
        "U_r": s * jax.random.normal(ks[8], (dim_hidden, dim_hidden), jnp.float32),
        "U_n": s * jax.random.normal(ks[9], (dim_hidden, dim_hidden), jnp.float32),
        "b_z": jnp.zeros((dim_hidden,), jnp.float32),
        "b_r": jnp.zeros((dim_hidden,), jnp.float32),
        "b_in": jnp.zeros((dim_hidden,), jnp.float32),
        "b_hn": jnp.zeros((dim_hidden,), jnp.float32),
    }


if __name__ == "__main__":
    # config: dim_ft=32, dim_hidden=32, dim_kernel=16, num_kernel=8, noise=0.0
    b, dim_ft, dim_hidden = 2, 32, 32
    dim_kernel, num_kernel = 16, 8
    max_step, vocab_size, dim_emb = 8, 50, 16

    key = jax.random.PRNGKey(0)
    k_fts, k_sents, k_params = jax.random.split(key, 3)

    fts = jax.random.normal(k_fts, (b, dim_ft), jnp.float32)        # (b, dim_ft)
    sents = jax.random.randint(k_sents, (max_step, b), 0, vocab_size,
                               dtype=jnp.int32)                     # (max_step, b)
    lens = jnp.array([8, 5], dtype=jnp.int32)                       # (b,)
    y = jnp.array([1, 0], dtype=jnp.int32)

    params = make_params(k_params, dim_ft, dim_hidden, dim_kernel,
                         num_kernel, vocab_size, dim_emb)
    packed = pack_params(params, num_kernel, dim_kernel)   # packed once, reused

    # 'trn' mode: (cross_entropy loss, dist2img)
    loss, dist2img = discriminator_forward("trn", fts, sents, lens, packed,
                                           num_kernel=num_kernel,
                                           dim_hidden=dim_hidden, y=y)
    # 'eval' mode: log_softmax(logits)[:, 1]
    log_p1 = discriminator_forward("eval", fts, sents, lens, packed,
                                   num_kernel=num_kernel, dim_hidden=dim_hidden)
    # default mode: softmax probabilities
    probs = discriminator_forward("tst", fts, sents, lens, packed,
                                  num_kernel=num_kernel, dim_hidden=dim_hidden)

    jax.block_until_ready((loss, dist2img, log_p1, probs))

    assert dist2img.shape == (b, num_kernel)
    assert log_p1.shape == (b,)
    assert probs.shape == (b, 2)
    assert bool(jnp.all(jnp.isfinite(loss)))
    assert bool(jnp.all(jnp.isfinite(dist2img)))
    assert bool(jnp.all(jnp.isfinite(probs)))
    assert bool(jnp.all(jnp.abs(jnp.sum(probs, axis=-1) - 1.0) < 1e-5))
    print("KERNEL_OK")
</pallas_src>

<mosaic_0001>
module attributes {stable_mosaic.version = 11 : i64} {
  func.func @_discriminator_kernel(%arg0: memref<8x128xf32, #tpu.memory_space<vmem>>, %arg1: memref<64x16xf32, #tpu.memory_space<vmem>>, %arg2: memref<8x1xi32, #tpu.memory_space<vmem>>, %arg3: memref<16x384xf32, #tpu.memory_space<vmem>>, %arg4: memref<1x384xf32, #tpu.memory_space<vmem>>, %arg5: memref<128x384xf32, #tpu.memory_space<vmem>>, %arg6: memref<256x256xf32, #tpu.memory_space<vmem>>, %arg7: memref<128x128xf32, #tpu.memory_space<vmem>>, %arg8: memref<128x128xf32, #tpu.memory_space<vmem>>, %arg9: memref<1x128xf32, #tpu.memory_space<vmem>>, %arg10: memref<8x128xf32, #tpu.memory_space<vmem>>) attributes {dimension_semantics = [], scalar_prefetch = 0 : i64, scratch_operands = 0 : i64, tpu.core_type = #tpu.core_type<tc>} {
    %c0 = arith.constant 0 : index
    %c0_0 = arith.constant 0 : index
    %0 = vector.load %arg1[%c0, %c0_0] : memref<64x16xf32, #tpu.memory_space<vmem>>, vector<64x16xf32>
    %c0_1 = arith.constant 0 : index
    %c0_2 = arith.constant 0 : index
    %1 = vector.load %arg3[%c0_1, %c0_2] : memref<16x384xf32, #tpu.memory_space<vmem>>, vector<16x384xf32>
    %cst = arith.constant dense<0.000000e+00> : vector<64x384xf32>
    %2 = tpu.matmul %0, %1, %cst {dimension_numbers = #tpu.dot_dimension_numbers<[1], [0], [0], [1], [0, 0, 1, 1], [], []>} : vector<64x16xf32>, vector<16x384xf32>, vector<64x384xf32> -> vector<64x384xf32>
    %c0_3 = arith.constant 0 : index
    %c0_4 = arith.constant 0 : index
    %3 = vector.load %arg4[%c0_3, %c0_4] : memref<1x384xf32, #tpu.memory_space<vmem>>, vector<1x384xf32>
    %4 = vector.broadcast %3 : vector<1x384xf32> to vector<64x384xf32>
    %5 = arith.addf %2, %4 : vector<64x384xf32>
    %c0_5 = arith.constant 0 : index
    %c0_6 = arith.constant 0 : index
    %6 = vector.load %arg5[%c0_5, %c0_6] : memref<128x384xf32, #tpu.memory_space<vmem>>, vector<128x384xf32>
    %c0_7 = arith.constant 0 : index
    %c0_8 = arith.constant 0 : index
    %7 = vector.load %arg2[%c0_7, %c0_8] : memref<8x1xi32, #tpu.memory_space<vmem>>, vector<8x1xi32>
    %8 = tpu.iota {dimensions = array<i32: 1>} : vector<8x128xi32>
    %c32_i32 = arith.constant 32 : i32
    %9 = vector.broadcast %c32_i32 : i32 to vector<8x128xi32>
    %10 = arith.cmpi eq, %8, %9 : vector<8x128xi32>
    %cst_9 = arith.constant 1.000000e+00 : f32
    %cst_10 = arith.constant 0.000000e+00 : f32
    %11 = vector.broadcast %cst_9 : f32 to vector<8x128xf32>
    %12 = vector.broadcast %cst_10 : f32 to vector<8x128xf32>
    %13 = arith.select %10, %11, %12 : vector<8x128xi1>, vector<8x128xf32>
    %14 = vector.extract_strided_slice %5 {offsets = [0, 0], sizes = [8, 384], strides = [1, 1]} : vector<64x384xf32> to vector<8x384xf32>
    %cst_11 = arith.constant dense<0.000000e+00> : vector<8x384xf32>
    %15 = tpu.matmul %13, %6, %cst_11 {dimension_numbers = #tpu.dot_dimension_numbers<[1], [0], [0], [1], [0, 0, 1, 1], [], []>} : vector<8x128xf32>, vector<128x384xf32>, vector<8x384xf32> -> vector<8x384xf32>
    %16 = vector.extract_strided_slice %14 {offsets = [0, 0], sizes = [8, 128], strides = [1, 1]} : vector<8x384xf32> to vector<8x128xf32>
    %17 = vector.extract_strided_slice %15 {offsets = [0, 0], sizes = [8, 128], strides = [1, 1]} : vector<8x384xf32> to vector<8x128xf32>
    %18 = arith.addf %16, %17 : vector<8x128xf32>
    %19 = arith.negf %18 : vector<8x128xf32>
    %20 = math.exp %19 : vector<8x128xf32>
    %cst_12 = arith.constant 1.000000e+00 : f32
    %21 = vector.broadcast %cst_12 : f32 to vector<8x128xf32>
    %22 = arith.addf %21, %20 : vector<8x128xf32>
    %23 = arith.divf %21, %22 : vector<8x128xf32>
    %24 = vector.extract_strided_slice %14 {offsets = [0, 128], sizes = [8, 128], strides = [1, 1]} : vector<8x384xf32> to vector<8x128xf32>
    %25 = vector.extract_strided_slice %15 {offsets = [0, 128], sizes = [8, 128], strides = [1, 1]} : vector<8x384xf32> to vector<8x128xf32>
    %26 = arith.addf %24, %25 : vector<8x128xf32>
    %27 = arith.negf %26 : vector<8x128xf32>
    %28 = math.exp %27 : vector<8x128xf32>
    %cst_13 = arith.constant 1.000000e+00 : f32
    %29 = vector.broadcast %cst_13 : f32 to vector<8x128xf32>
    %30 = arith.addf %29, %28 : vector<8x128xf32>
    %31 = arith.divf %29, %30 : vector<8x128xf32>
    %32 = vector.extract_strided_slice %14 {offsets = [0, 256], sizes = [8, 128], strides = [1, 1]} : vector<8x384xf32> to vector<8x128xf32>
    %33 = vector.extract_strided_slice %15 {offsets = [0, 256], sizes = [8, 128], strides = [1, 1]} : vector<8x384xf32> to vector<8x128xf32>
    %34 = arith.mulf %31, %33 : vector<8x128xf32>
    %35 = arith.addf %32, %34 : vector<8x128xf32>
    %36 = math.tanh %35 : vector<8x128xf32>
    %cst_14 = arith.constant 1.000000e+00 : f32
    %37 = vector.broadcast %cst_14 : f32 to vector<8x128xf32>
    %38 = arith.subf %37, %23 : vector<8x128xf32>
    %39 = arith.mulf %38, %36 : vector<8x128xf32>
    %40 = arith.mulf %23, %13 : vector<8x128xf32>
    %41 = arith.addf %39, %40 : vector<8x128xf32>
    %c0_i32 = arith.constant 0 : i32
    %42 = vector.broadcast %c0_i32 : i32 to vector<8x1xi32>
    %43 = arith.cmpi sgt, %7, %42 : vector<8x1xi32>
    %44 = vector.shape_cast %43 : vector<8x1xi1> to vector<8x1xi1>
    %45 = vector.broadcast %44 : vector<8x1xi1> to vector<8x128xi1>
    %46 = arith.select %45, %41, %13 : vector<8x128xi1>, vector<8x128xf32>
    %47 = vector.extract_strided_slice %5 {offsets = [8, 0], sizes = [8, 384], strides = [1, 1]} : vector<64x384xf32> to vector<8x384xf32>
    %cst_15 = arith.constant dense<0.000000e+00> : vector<8x384xf32>
    %48 = tpu.matmul %46, %6, %cst_15 {dimension_numbers = #tpu.dot_dimension_numbers<[1], [0], [0], [1], [0, 0, 1, 1], [], []>} : vector<8x128xf32>, vector<128x384xf32>, vector<8x384xf32> -> vector<8x384xf32>
    %49 = vector.extract_strided_slice %47 {offsets = [0, 0], sizes = [8, 128], strides = [1, 1]} : vector<8x384xf32> to vector<8x128xf32>
    %50 = vector.extract_strided_slice %48 {offsets = [0, 0], sizes = [8, 128], strides = [1, 1]} : vector<8x384xf32> to vector<8x128xf32>
    %51 = arith.addf %49, %50 : vector<8x128xf32>
    %52 = arith.negf %51 : vector<8x128xf32>
    %53 = math.exp %52 : vector<8x128xf32>
    %cst_16 = arith.constant 1.000000e+00 : f32
    %54 = vector.broadcast %cst_16 : f32 to vector<8x128xf32>
    %55 = arith.addf %54, %53 : vector<8x128xf32>
    %56 = arith.divf %54, %55 : vector<8x128xf32>
    %57 = vector.extract_strided_slice %47 {offsets = [0, 128], sizes = [8, 128], strides = [1, 1]} : vector<8x384xf32> to vector<8x128xf32>
    %58 = vector.extract_strided_slice %48 {offsets = [0, 128], sizes = [8, 128], strides = [1, 1]} : vector<8x384xf32> to vector<8x128xf32>
    %59 = arith.addf %57, %58 : vector<8x128xf32>
    %60 = arith.negf %59 : vector<8x128xf32>
    %61 = math.exp %60 : vector<8x128xf32>
    %cst_17 = arith.constant 1.000000e+00 : f32
    %62 = vector.broadcast %cst_17 : f32 to vector<8x128xf32>
    %63 = arith.addf %62, %61 : vector<8x128xf32>
    %64 = arith.divf %62, %63 : vector<8x128xf32>
    %65 = vector.extract_strided_slice %47 {offsets = [0, 256], sizes = [8, 128], strides = [1, 1]} : vector<8x384xf32> to vector<8x128xf32>
    %66 = vector.extract_strided_slice %48 {offsets = [0, 256], sizes = [8, 128], strides = [1, 1]} : vector<8x384xf32> to vector<8x128xf32>
    %67 = arith.mulf %64, %66 : vector<8x128xf32>
    %68 = arith.addf %65, %67 : vector<8x128xf32>
    %69 = math.tanh %68 : vector<8x128xf32>
    %cst_18 = arith.constant 1.000000e+00 : f32
    %70 = vector.broadcast %cst_18 : f32 to vector<8x128xf32>
    %71 = arith.subf %70, %56 : vector<8x128xf32>
    %72 = arith.mulf %71, %69 : vector<8x128xf32>
    %73 = arith.mulf %56, %46 : vector<8x128xf32>
    %74 = arith.addf %72, %73 : vector<8x128xf32>
    %c1_i32 = arith.constant 1 : i32
    %75 = vector.broadcast %c1_i32 : i32 to vector<8x1xi32>
    %76 = arith.cmpi sgt, %7, %75 : vector<8x1xi32>
    %77 = vector.shape_cast %76 : vector<8x1xi1> to vector<8x1xi1>
    %78 = vector.broadcast %77 : vector<8x1xi1> to vector<8x128xi1>
    %79 = arith.select %78, %74, %46 : vector<8x128xi1>, vector<8x128xf32>
    %80 = vector.extract_strided_slice %5 {offsets = [16, 0], sizes = [8, 384], strides = [1, 1]} : vector<64x384xf32> to vector<8x384xf32>
    %cst_19 = arith.constant dense<0.000000e+00> : vector<8x384xf32>
    %81 = tpu.matmul %79, %6, %cst_19 {dimension_numbers = #tpu.dot_dimension_numbers<[1], [0], [0], [1], [0, 0, 1, 1], [], []>} : vector<8x128xf32>, vector<128x384xf32>, vector<8x384xf32> -> vector<8x384xf32>
    %82 = vector.extract_strided_slice %80 {offsets = [0, 0], sizes = [8, 128], strides = [1, 1]} : vector<8x384xf32> to vector<8x128xf32>
    %83 = vector.extract_strided_slice %81 {offsets = [0, 0], sizes = [8, 128], strides = [1, 1]} : vector<8x384xf32> to vector<8x128xf32>
    %84 = arith.addf %82, %83 : vector<8x128xf32>
    %85 = arith.negf %84 : vector<8x128xf32>
    %86 = math.exp %85 : vector<8x128xf32>
    %cst_20 = arith.constant 1.000000e+00 : f32
    %87 = vector.broadcast %cst_20 : f32 to vector<8x128xf32>
    %88 = arith.addf %87, %86 : vector<8x128xf32>
    %89 = arith.divf %87, %88 : vector<8x128xf32>
    %90 = vector.extract_strided_slice %80 {offsets = [0, 128], sizes = [8, 128], strides = [1, 1]} : vector<8x384xf32> to vector<8x128xf32>
    %91 = vector.extract_strided_slice %81 {offsets = [0, 128], sizes = [8, 128], strides = [1, 1]} : vector<8x384xf32> to vector<8x128xf32>
    %92 = arith.addf %90, %91 : vector<8x128xf32>
    %93 = arith.negf %92 : vector<8x128xf32>
    %94 = math.exp %93 : vector<8x128xf32>
    %cst_21 = arith.constant 1.000000e+00 : f32
    %95 = vector.broadcast %cst_21 : f32 to vector<8x128xf32>
    %96 = arith.addf %95, %94 : vector<8x128xf32>
    %97 = arith.divf %95, %96 : vector<8x128xf32>
    %98 = vector.extract_strided_slice %80 {offsets = [0, 256], sizes = [8, 128], strides = [1, 1]} : vector<8x384xf32> to vector<8x128xf32>
    %99 = vector.extract_strided_slice %81 {offsets = [0, 256], sizes = [8, 128], strides = [1, 1]} : vector<8x384xf32> to vector<8x128xf32>
    %100 = arith.mulf %97, %99 : vector<8x128xf32>
    %101 = arith.addf %98, %100 : vector<8x128xf32>
    %102 = math.tanh %101 : vector<8x128xf32>
    %cst_22 = arith.constant 1.000000e+00 : f32
    %103 = vector.broadcast %cst_22 : f32 to vector<8x128xf32>
    %104 = arith.subf %103, %89 : vector<8x128xf32>
    %105 = arith.mulf %104, %102 : vector<8x128xf32>
    %106 = arith.mulf %89, %79 : vector<8x128xf32>
    %107 = arith.addf %105, %106 : vector<8x128xf32>
    %c2_i32 = arith.constant 2 : i32
    %108 = vector.broadcast %c2_i32 : i32 to vector<8x1xi32>
    %109 = arith.cmpi sgt, %7, %108 : vector<8x1xi32>
    %110 = vector.shape_cast %109 : vector<8x1xi1> to vector<8x1xi1>
    %111 = vector.broadcast %110 : vector<8x1xi1> to vector<8x128xi1>
    %112 = arith.select %111, %107, %79 : vector<8x128xi1>, vector<8x128xf32>
    %113 = vector.extract_strided_slice %5 {offsets = [24, 0], sizes = [8, 384], strides = [1, 1]} : vector<64x384xf32> to vector<8x384xf32>
    %cst_23 = arith.constant dense<0.000000e+00> : vector<8x384xf32>
    %114 = tpu.matmul %112, %6, %cst_23 {dimension_numbers = #tpu.dot_dimension_numbers<[1], [0], [0], [1], [0, 0, 1, 1], [], []>} : vector<8x128xf32>, vector<128x384xf32>, vector<8x384xf32> -> vector<8x384xf32>
    %115 = vector.extract_strided_slice %113 {offsets = [0, 0], sizes = [8, 128], strides = [1, 1]} : vector<8x384xf32> to vector<8x128xf32>
    %116 = vector.extract_strided_slice %114 {offsets = [0, 0], sizes = [8, 128], strides = [1, 1]} : vector<8x384xf32> to vector<8x128xf32>
    %117 = arith.addf %115, %116 : vector<8x128xf32>
    %118 = arith.negf %117 : vector<8x128xf32>
    %119 = math.exp %118 : vector<8x128xf32>
    %cst_24 = arith.constant 1.000000e+00 : f32
    %120 = vector.broadcast %cst_24 : f32 to vector<8x128xf32>
    %121 = arith.addf %120, %119 : vector<8x128xf32>
    %122 = arith.divf %120, %121 : vector<8x128xf32>
    %123 = vector.extract_strided_slice %113 {offsets = [0, 128], sizes = [8, 128], strides = [1, 1]} : vector<8x384xf32> to vector<8x128xf32>
    %124 = vector.extract_strided_slice %114 {offsets = [0, 128], sizes = [8, 128], strides = [1, 1]} : vector<8x384xf32> to vector<8x128xf32>
    %125 = arith.addf %123, %124 : vector<8x128xf32>
    %126 = arith.negf %125 : vector<8x128xf32>
    %127 = math.exp %126 : vector<8x128xf32>
    %cst_25 = arith.constant 1.000000e+00 : f32
    %128 = vector.broadcast %cst_25 : f32 to vector<8x128xf32>
    %129 = arith.addf %128, %127 : vector<8x128xf32>
    %130 = arith.divf %128, %129 : vector<8x128xf32>
    %131 = vector.extract_strided_slice %113 {offsets = [0, 256], sizes = [8, 128], strides = [1, 1]} : vector<8x384xf32> to vector<8x128xf32>
    %132 = vector.extract_strided_slice %114 {offsets = [0, 256], sizes = [8, 128], strides = [1, 1]} : vector<8x384xf32> to vector<8x128xf32>
    %133 = arith.mulf %130, %132 : vector<8x128xf32>
    %134 = arith.addf %131, %133 : vector<8x128xf32>
    %135 = math.tanh %134 : vector<8x128xf32>
    %cst_26 = arith.constant 1.000000e+00 : f32
    %136 = vector.broadcast %cst_26 : f32 to vector<8x128xf32>
    %137 = arith.subf %136, %122 : vector<8x128xf32>
    %138 = arith.mulf %137, %135 : vector<8x128xf32>
    %139 = arith.mulf %122, %112 : vector<8x128xf32>
    %140 = arith.addf %138, %139 : vector<8x128xf32>
    %c3_i32 = arith.constant 3 : i32
    %141 = vector.broadcast %c3_i32 : i32 to vector<8x1xi32>
    %142 = arith.cmpi sgt, %7, %141 : vector<8x1xi32>
    %143 = vector.shape_cast %142 : vector<8x1xi1> to vector<8x1xi1>
    %144 = vector.broadcast %143 : vector<8x1xi1> to vector<8x128xi1>
    %145 = arith.select %144, %140, %112 : vector<8x128xi1>, vector<8x128xf32>
    %146 = vector.extract_strided_slice %5 {offsets = [32, 0], sizes = [8, 384], strides = [1, 1]} : vector<64x384xf32> to vector<8x384xf32>
    %cst_27 = arith.constant dense<0.000000e+00> : vector<8x384xf32>
    %147 = tpu.matmul %145, %6, %cst_27 {dimension_numbers = #tpu.dot_dimension_numbers<[1], [0], [0], [1], [0, 0, 1, 1], [], []>} : vector<8x128xf32>, vector<128x384xf32>, vector<8x384xf32> -> vector<8x384xf32>
    %148 = vector.extract_strided_slice %146 {offsets = [0, 0], sizes = [8, 128], strides = [1, 1]} : vector<8x384xf32> to vector<8x128xf32>
    %149 = vector.extract_strided_slice %147 {offsets = [0, 0], sizes = [8, 128], strides = [1, 1]} : vector<8x384xf32> to vector<8x128xf32>
    %150 = arith.addf %148, %149 : vector<8x128xf32>
    %151 = arith.negf %150 : vector<8x128xf32>
    %152 = math.exp %151 : vector<8x128xf32>
    %cst_28 = arith.constant 1.000000e+00 : f32
    %153 = vector.broadcast %cst_28 : f32 to vector<8x128xf32>
    %154 = arith.addf %153, %152 : vector<8x128xf32>
    %155 = arith.divf %153, %154 : vector<8x128xf32>
    %156 = vector.extract_strided_slice %146 {offsets = [0, 128], sizes = [8, 128], strides = [1, 1]} : vector<8x384xf32> to vector<8x128xf32>
    %157 = vector.extract_strided_slice %147 {offsets = [0, 128], sizes = [8, 128], strides = [1, 1]} : vector<8x384xf32> to vector<8x128xf32>
    %158 = arith.addf %156, %157 : vector<8x128xf32>
    %159 = arith.negf %158 : vector<8x128xf32>
    %160 = math.exp %159 : vector<8x128xf32>
    %cst_29 = arith.constant 1.000000e+00 : f32
    %161 = vector.broadcast %cst_29 : f32 to vector<8x128xf32>
    %162 = arith.addf %161, %160 : vector<8x128xf32>
    %163 = arith.divf %161, %162 : vector<8x128xf32>
    %164 = vector.extract_strided_slice %146 {offsets = [0, 256], sizes = [8, 128], strides = [1, 1]} : vector<8x384xf32> to vector<8x128xf32>
    %165 = vector.extract_strided_slice %147 {offsets = [0, 256], sizes = [8, 128], strides = [1, 1]} : vector<8x384xf32> to vector<8x128xf32>
    %166 = arith.mulf %163, %165 : vector<8x128xf32>
    %167 = arith.addf %164, %166 : vector<8x128xf32>
    %168 = math.tanh %167 : vector<8x128xf32>
    %cst_30 = arith.constant 1.000000e+00 : f32
    %169 = vector.broadcast %cst_30 : f32 to vector<8x128xf32>
    %170 = arith.subf %169, %155 : vector<8x128xf32>
    %171 = arith.mulf %170, %168 : vector<8x128xf32>
    %172 = arith.mulf %155, %145 : vector<8x128xf32>
    %173 = arith.addf %171, %172 : vector<8x128xf32>
    %c4_i32 = arith.constant 4 : i32
    %174 = vector.broadcast %c4_i32 : i32 to vector<8x1xi32>
    %175 = arith.cmpi sgt, %7, %174 : vector<8x1xi32>
    %176 = vector.shape_cast %175 : vector<8x1xi1> to vector<8x1xi1>
    %177 = vector.broadcast %176 : vector<8x1xi1> to vector<8x128xi1>
    %178 = arith.select %177, %173, %145 : vector<8x128xi1>, vector<8x128xf32>
    %179 = vector.extract_strided_slice %5 {offsets = [40, 0], sizes = [8, 384], strides = [1, 1]} : vector<64x384xf32> to vector<8x384xf32>
    %cst_31 = arith.constant dense<0.000000e+00> : vector<8x384xf32>
    %180 = tpu.matmul %178, %6, %cst_31 {dimension_numbers = #tpu.dot_dimension_numbers<[1], [0], [0], [1], [0, 0, 1, 1], [], []>} : vector<8x128xf32>, vector<128x384xf32>, vector<8x384xf32> -> vector<8x384xf32>
    %181 = vector.extract_strided_slice %179 {offsets = [0, 0], sizes = [8, 128], strides = [1, 1]} : vector<8x384xf32> to vector<8x128xf32>
    %182 = vector.extract_strided_slice %180 {offsets = [0, 0], sizes = [8, 128], strides = [1, 1]} : vector<8x384xf32> to vector<8x128xf32>
    %183 = arith.addf %181, %182 : vector<8x128xf32>
    %184 = arith.negf %183 : vector<8x128xf32>
    %185 = math.exp %184 : vector<8x128xf32>
    %cst_32 = arith.constant 1.000000e+00 : f32
    %186 = vector.broadcast %cst_32 : f32 to vector<8x128xf32>
    %187 = arith.addf %186, %185 : vector<8x128xf32>
    %188 = arith.divf %186, %187 : vector<8x128xf32>
    %189 = vector.extract_strided_slice %179 {offsets = [0, 128], sizes = [8, 128], strides = [1, 1]} : vector<8x384xf32> to vector<8x128xf32>
    %190 = vector.extract_strided_slice %180 {offsets = [0, 128], sizes = [8, 128], strides = [1, 1]} : vector<8x384xf32> to vector<8x128xf32>
    %191 = arith.addf %189, %190 : vector<8x128xf32>
    %192 = arith.negf %191 : vector<8x128xf32>
    %193 = math.exp %192 : vector<8x128xf32>
    %cst_33 = arith.constant 1.000000e+00 : f32
    %194 = vector.broadcast %cst_33 : f32 to vector<8x128xf32>
    %195 = arith.addf %194, %193 : vector<8x128xf32>
    %196 = arith.divf %194, %195 : vector<8x128xf32>
    %197 = vector.extract_strided_slice %179 {offsets = [0, 256], sizes = [8, 128], strides = [1, 1]} : vector<8x384xf32> to vector<8x128xf32>
    %198 = vector.extract_strided_slice %180 {offsets = [0, 256], sizes = [8, 128], strides = [1, 1]} : vector<8x384xf32> to vector<8x128xf32>
    %199 = arith.mulf %196, %198 : vector<8x128xf32>
    %200 = arith.addf %197, %199 : vector<8x128xf32>
    %201 = math.tanh %200 : vector<8x128xf32>
    %cst_34 = arith.constant 1.000000e+00 : f32
    %202 = vector.broadcast %cst_34 : f32 to vector<8x128xf32>
    %203 = arith.subf %202, %188 : vector<8x128xf32>
    %204 = arith.mulf %203, %201 : vector<8x128xf32>
    %205 = arith.mulf %188, %178 : vector<8x128xf32>
    %206 = arith.addf %204, %205 : vector<8x128xf32>
    %c5_i32 = arith.constant 5 : i32
    %207 = vector.broadcast %c5_i32 : i32 to vector<8x1xi32>
    %208 = arith.cmpi sgt, %7, %207 : vector<8x1xi32>
    %209 = vector.shape_cast %208 : vector<8x1xi1> to vector<8x1xi1>
    %210 = vector.broadcast %209 : vector<8x1xi1> to vector<8x128xi1>
    %211 = arith.select %210, %206, %178 : vector<8x128xi1>, vector<8x128xf32>
    %212 = vector.extract_strided_slice %5 {offsets = [48, 0], sizes = [8, 384], strides = [1, 1]} : vector<64x384xf32> to vector<8x384xf32>
    %cst_35 = arith.constant dense<0.000000e+00> : vector<8x384xf32>
    %213 = tpu.matmul %211, %6, %cst_35 {dimension_numbers = #tpu.dot_dimension_numbers<[1], [0], [0], [1], [0, 0, 1, 1], [], []>} : vector<8x128xf32>, vector<128x384xf32>, vector<8x384xf32> -> vector<8x384xf32>
    %214 = vector.extract_strided_slice %212 {offsets = [0, 0], sizes = [8, 128], strides = [1, 1]} : vector<8x384xf32> to vector<8x128xf32>
    %215 = vector.extract_strided_slice %213 {offsets = [0, 0], sizes = [8, 128], strides = [1, 1]} : vector<8x384xf32> to vector<8x128xf32>
    %216 = arith.addf %214, %215 : vector<8x128xf32>
    %217 = arith.negf %216 : vector<8x128xf32>
    %218 = math.exp %217 : vector<8x128xf32>
    %cst_36 = arith.constant 1.000000e+00 : f32
    %219 = vector.broadcast %cst_36 : f32 to vector<8x128xf32>
    %220 = arith.addf %219, %218 : vector<8x128xf32>
    %221 = arith.divf %219, %220 : vector<8x128xf32>
    %222 = vector.extract_strided_slice %212 {offsets = [0, 128], sizes = [8, 128], strides = [1, 1]} : vector<8x384xf32> to vector<8x128xf32>
    %223 = vector.extract_strided_slice %213 {offsets = [0, 128], sizes = [8, 128], strides = [1, 1]} : vector<8x384xf32> to vector<8x128xf32>
    %224 = arith.addf %222, %223 : vector<8x128xf32>
    %225 = arith.negf %224 : vector<8x128xf32>
    %226 = math.exp %225 : vector<8x128xf32>
    %cst_37 = arith.constant 1.000000e+00 : f32
    %227 = vector.broadcast %cst_37 : f32 to vector<8x128xf32>
    %228 = arith.addf %227, %226 : vector<8x128xf32>
    %229 = arith.divf %227, %228 : vector<8x128xf32>
    %230 = vector.extract_strided_slice %212 {offsets = [0, 256], sizes = [8, 128], strides = [1, 1]} : vector<8x384xf32> to vector<8x128xf32>
    %231 = vector.extract_strided_slice %213 {offsets = [0, 256], sizes = [8, 128], strides = [1, 1]} : vector<8x384xf32> to vector<8x128xf32>
    %232 = arith.mulf %229, %231 : vector<8x128xf32>
    %233 = arith.addf %230, %232 : vector<8x128xf32>
    %234 = math.tanh %233 : vector<8x128xf32>
    %cst_38 = arith.constant 1.000000e+00 : f32
    %235 = vector.broadcast %cst_38 : f32 to vector<8x128xf32>
    %236 = arith.subf %235, %221 : vector<8x128xf32>
    %237 = arith.mulf %236, %234 : vector<8x128xf32>
    %238 = arith.mulf %221, %211 : vector<8x128xf32>
    %239 = arith.addf %237, %238 : vector<8x128xf32>
    %c6_i32 = arith.constant 6 : i32
    %240 = vector.broadcast %c6_i32 : i32 to vector<8x1xi32>
    %241 = arith.cmpi sgt, %7, %240 : vector<8x1xi32>
    %242 = vector.shape_cast %241 : vector<8x1xi1> to vector<8x1xi1>
    %243 = vector.broadcast %242 : vector<8x1xi1> to vector<8x128xi1>
    %244 = arith.select %243, %239, %211 : vector<8x128xi1>, vector<8x128xf32>
    %245 = vector.extract_strided_slice %5 {offsets = [56, 0], sizes = [8, 384], strides = [1, 1]} : vector<64x384xf32> to vector<8x384xf32>
    %cst_39 = arith.constant dense<0.000000e+00> : vector<8x384xf32>
    %246 = tpu.matmul %244, %6, %cst_39 {dimension_numbers = #tpu.dot_dimension_numbers<[1], [0], [0], [1], [0, 0, 1, 1], [], []>} : vector<8x128xf32>, vector<128x384xf32>, vector<8x384xf32> -> vector<8x384xf32>
    %247 = vector.extract_strided_slice %245 {offsets = [0, 0], sizes = [8, 128], strides = [1, 1]} : vector<8x384xf32> to vector<8x128xf32>
    %248 = vector.extract_strided_slice %246 {offsets = [0, 0], sizes = [8, 128], strides = [1, 1]} : vector<8x384xf32> to vector<8x128xf32>
    %249 = arith.addf %247, %248 : vector<8x128xf32>
    %250 = arith.negf %249 : vector<8x128xf32>
    %251 = math.exp %250 : vector<8x128xf32>
    %cst_40 = arith.constant 1.000000e+00 : f32
    %252 = vector.broadcast %cst_40 : f32 to vector<8x128xf32>
    %253 = arith.addf %252, %251 : vector<8x128xf32>
    %254 = arith.divf %252, %253 : vector<8x128xf32>
    %255 = vector.extract_strided_slice %245 {offsets = [0, 128], sizes = [8, 128], strides = [1, 1]} : vector<8x384xf32> to vector<8x128xf32>
    %256 = vector.extract_strided_slice %246 {offsets = [0, 128], sizes = [8, 128], strides = [1, 1]} : vector<8x384xf32> to vector<8x128xf32>
    %257 = arith.addf %255, %256 : vector<8x128xf32>
    %258 = arith.negf %257 : vector<8x128xf32>
    %259 = math.exp %258 : vector<8x128xf32>
    %cst_41 = arith.constant 1.000000e+00 : f32
    %260 = vector.broadcast %cst_41 : f32 to vector<8x128xf32>
    %261 = arith.addf %260, %259 : vector<8x128xf32>
    %262 = arith.divf %260, %261 : vector<8x128xf32>
    %263 = vector.extract_strided_slice %245 {offsets = [0, 256], sizes = [8, 128], strides = [1, 1]} : vector<8x384xf32> to vector<8x128xf32>
    %264 = vector.extract_strided_slice %246 {offsets = [0, 256], sizes = [8, 128], strides = [1, 1]} : vector<8x384xf32> to vector<8x128xf32>
    %265 = arith.mulf %262, %264 : vector<8x128xf32>
    %266 = arith.addf %263, %265 : vector<8x128xf32>
    %267 = math.tanh %266 : vector<8x128xf32>
    %cst_42 = arith.constant 1.000000e+00 : f32
    %268 = vector.broadcast %cst_42 : f32 to vector<8x128xf32>
    %269 = arith.subf %268, %254 : vector<8x128xf32>
    %270 = arith.mulf %269, %267 : vector<8x128xf32>
    %271 = arith.mulf %254, %244 : vector<8x128xf32>
    %272 = arith.addf %270, %271 : vector<8x128xf32>
    %c7_i32 = arith.constant 7 : i32
    %273 = vector.broadcast %c7_i32 : i32 to vector<8x1xi32>
    %274 = arith.cmpi sgt, %7, %273 : vector<8x1xi32>
    %275 = vector.shape_cast %274 : vector<8x1xi1> to vector<8x1xi1>
    %276 = vector.broadcast %275 : vector<8x1xi1> to vector<8x128xi1>
    %277 = arith.select %276, %272, %244 : vector<8x128xi1>, vector<8x128xf32>
    %c0_43 = arith.constant 0 : index
    %c0_44 = arith.constant 0 : index
    %278 = vector.load %arg0[%c0_43, %c0_44] : memref<8x128xf32, #tpu.memory_space<vmem>>, vector<8x128xf32>
    %279 = tpu.concatenate %278, %277 in 1 : vector<8x128xf32>, vector<8x128xf32> -> vector<8x256xf32>
    %c0_45 = arith.constant 0 : index
    %c0_46 = arith.constant 0 : index
    %280 = vector.load %arg6[%c0_45, %c0_46] : memref<256x256xf32, #tpu.memory_space<vmem>>, vector<256x256xf32>
    %cst_47 = arith.constant dense<0.000000e+00> : vector<8x256xf32>
    %281 = tpu.matmul %279, %280, %cst_47 {dimension_numbers = #tpu.dot_dimension_numbers<[1], [0], [0], [1], [0, 0, 1, 1], [], []>} : vector<8x256xf32>, vector<256x256xf32>, vector<8x256xf32> -> vector<8x256xf32>
    %282 = vector.extract_strided_slice %281 {offsets = [0, 0], sizes = [8, 128], strides = [1, 1]} : vector<8x256xf32> to vector<8x128xf32>
    %283 = vector.extract_strided_slice %281 {offsets = [0, 128], sizes = [8, 128], strides = [1, 1]} : vector<8x256xf32> to vector<8x128xf32>
    %284 = arith.mulf %282, %283 : vector<8x128xf32>
    %c0_48 = arith.constant 0 : index
    %c0_49 = arith.constant 0 : index
    %285 = vector.load %arg7[%c0_48, %c0_49] : memref<128x128xf32, #tpu.memory_space<vmem>>, vector<128x128xf32>
    %cst_50 = arith.constant dense<0.000000e+00> : vector<8x128xf32>
    %286 = tpu.matmul %284, %285, %cst_50 {dimension_numbers = #tpu.dot_dimension_numbers<[1], [0], [0], [1], [0, 0, 1, 1], [], []>} : vector<8x128xf32>, vector<128x128xf32>, vector<8x128xf32> -> vector<8x128xf32>
    %287 = math.tanh %286 : vector<8x128xf32>
    %c0_51 = arith.constant 0 : index
    %c0_52 = arith.constant 0 : index
    %288 = vector.load %arg8[%c0_51, %c0_52] : memref<128x128xf32, #tpu.memory_space<vmem>>, vector<128x128xf32>
    %cst_53 = arith.constant dense<0.000000e+00> : vector<8x128xf32>
    %289 = tpu.matmul %287, %288, %cst_53 {dimension_numbers = #tpu.dot_dimension_numbers<[1], [0], [0], [1], [0, 0, 1, 1], [], []>} : vector<8x128xf32>, vector<128x128xf32>, vector<8x128xf32> -> vector<8x128xf32>
    %c0_54 = arith.constant 0 : index
    %c0_55 = arith.constant 0 : index
    %290 = vector.load %arg9[%c0_54, %c0_55] : memref<1x128xf32, #tpu.memory_space<vmem>>, vector<1x128xf32>
    %291 = vector.broadcast %290 : vector<1x128xf32> to vector<8x128xf32>
    %292 = arith.addf %289, %291 : vector<8x128xf32>
    %293 = arith.addf %292, %287 : vector<8x128xf32>
    %294 = vector.extract_strided_slice %293 {offsets = [0, 0], sizes = [8, 1], strides = [1, 1]} : vector<8x128xf32> to vector<8x1xf32>
    %295 = vector.extract_strided_slice %293 {offsets = [0, 1], sizes = [8, 1], strides = [1, 1]} : vector<8x128xf32> to vector<8x1xf32>
    %296 = arith.maximumf %294, %295 : vector<8x1xf32>
    %297 = arith.subf %294, %296 : vector<8x1xf32>
    %298 = math.exp %297 : vector<8x1xf32>
    %299 = arith.subf %295, %296 : vector<8x1xf32>
    %300 = math.exp %299 : vector<8x1xf32>
    %301 = arith.addf %298, %300 : vector<8x1xf32>
    %302 = math.log %301 : vector<8x1xf32>
    %303 = arith.addf %296, %302 : vector<8x1xf32>
    %304 = tpu.iota {dimensions = array<i32: 1>} : vector<8x128xi32>
    %c10_i32 = arith.constant 10 : i32
    %305 = vector.broadcast %c10_i32 : i32 to vector<8x128xi32>
    %306 = arith.cmpi sge, %304, %305 : vector<8x128xi32>
    %c12_i32 = arith.constant 12 : i32
    %307 = vector.broadcast %c12_i32 : i32 to vector<8x128xi32>
    %308 = arith.cmpi slt, %304, %307 : vector<8x128xi32>
    %309 = arith.andi %306, %308 : vector<8x128xi1>
    %310 = arith.extui %309 : vector<8x128xi1> to vector<8x128xi32>
    %311 = arith.sitofp %310 : vector<8x128xi32> to vector<8x128xf32>
    %312 = vector.broadcast %303 : vector<8x1xf32> to vector<8x128xf32>
    %313 = arith.mulf %312, %311 : vector<8x128xf32>
    %314 = arith.subf %293, %313 : vector<8x128xf32>
    %c0_56 = arith.constant 0 : index
    %c0_57 = arith.constant 0 : index
    %315 = vector.load %arg10[%c0_56, %c0_57] : memref<8x128xf32, #tpu.memory_space<vmem>>, vector<8x128xf32>
    tpu.vector_store %arg10[%c0_56, %c0_57], %314 {strides = array<i32>} : memref<8x128xf32, #tpu.memory_space<vmem>>, vector<8x128xf32>,
    return
  }
}

</mosaic_0001>

<bundles_post_ra>
// kernel: discriminator_forward.1
= control target key start
LH: loop header
LB: loop body
LE: loop exit
PB: predicated region body
PF: predicated region fallthrough
CT: control target
= control target key end

     0   :  { %15 = vsyncpa [#allocation3], 0  ;;  %s4356_s0 = inlined_call_operand.vmem [shape: f32[8,128], index: 0, kind: input, shape index: {}]   ;;  %s4357_s1 = inlined_call_operand.vmem [shape: f32[64,16], index: 1, kind: input, shape index: {}]   ;;  %s4358_s2 = inlined_call_operand.vmem [shape: s32[8,1], index: 2, kind: input, shape index: {}]   ;;  %s4359_s3 = inlined_call_operand.hbm [shape: f32[16,384], index: 3, kind: input, shape index: {}]   ;;  %s4360_s4 = inlined_call_operand.vmem [shape: f32[1,384], index: 4, kind: input, shape index: {}]   ;;  %s4361_s5 = inlined_call_operand.vmem [shape: f32[128,384], index: 5, kind: input, shape index: {}]   ;;  %s4362_s6 = inlined_call_operand.hbm [shape: f32[256,256], index: 6, kind: input, shape index: {}]   ;;  %s4363_s7 = inlined_call_operand.hbm [shape: f32[128,128], index: 7, kind: input, shape index: {}]   ;;  %s4364_s8 = inlined_call_operand.hbm [shape: f32[128,128], index: 8, kind: input, shape index: {}]   ;;  %s4365_s9 = inlined_call_operand.hbm [shape: f32[1,128], index: 9, kind: input, shape index: {}]   ;;  %s4366_s10 = inlined_call_operand.vmem [shape: f32[8,128], index: 10, kind: output, shape index: {}]  }
   0x1   :  { %16 = vsyncpa [#allocation5], 0 }
   0x2   :  { %17 = vsyncpa [#allocation8], 0  ;;  %s3547_s13 = smov [#allocation4]   ;;  %s3431_s17 = scalar_lea.hbm %s4362_s6, 8192 }
   0x3   :  { %s45_s14 = sshll.u32 %s3547_s13, 4  ;;  %p3432_p0 = scmp.ne.s32.totalorder %s4362_s6, %s3431_s17  ;;  %s46_s14 = int_to_ptr.vmem [resolvable:$true] %s45_s14 }
   0x4   :  { %p3435_p1 = scmp.lt.u32.totalorder %s3431_s17, %s4362_s6 }
   0x6   :  { %p3437_p2 = pnand %p3435_p1, %p3432_p0 }
   0x8   :  { %3440 = shalt.err (!%p3437_p2)
}
   0x9   :  { %s3441_s22 = scalar_lea.vmem %s46_s14, 8192  ;;  %p3446_p4 = scmp.lt.s32.totalorder %s46_s14, %s46_s14 }
   0xa   :  { %p3442_p3 = scmp.ne.s32.totalorder %s46_s14, %s3441_s22  ;;  %p3447_p5 = scmp.lt.s32.totalorder %s3441_s22, %s3441_s22 }
   0xc   :  { %p3448_p6 = por %p3447_p5, %p3446_p4 }
   0xe   :  { %p3449_p7 = pnand %p3448_p6, %p3442_p3 }
  0x10   :  { %3452 = shalt.err (!%p3449_p7)
}
  0x11   :  { %s3548_s23 = smov 256   ;;  %s3549_s24 = smov 16  }
  0x12   :  { %51 = dma.hbm_to_vmem [thread:$0]  %s4362_s6, 8192, %s46_s14, [#allocation5], %s3548_s23, %s3548_s23, %s3549_s24  }
  0x13   :  { %s3550_s27 = smov [#allocation7]   ;;  %s3551_s29 = smov [#allocation2]  }
  0x14   :  { %s69_s28 = sshll.u32 %s3550_s27, 4  ;;  %s29_s30 = sshll.u32 %s3551_s29, 4  ;;  %s70_s28 = int_to_ptr.vmem [resolvable:$true] %s69_s28  ;;  %s30_s30 = int_to_ptr.vmem [resolvable:$true] %s29_s30 }
  0x15   :  { %s3453_s13 = scalar_lea.hbm %s4364_s8, 2048 }
  0x16   :  { %p3454_p8 = scmp.ne.s32.totalorder %s4364_s8, %s3453_s13  ;;  %p3457_p9 = scmp.lt.u32.totalorder %s3453_s13, %s4364_s8 }
  0x18   :  { %p3459_p10 = pnand %p3457_p9, %p3454_p8 }
  0x1a   :  { %3462 = shalt.err (!%p3459_p10)
}
  0x1b   :  { %s3463_s6 = scalar_lea.vmem %s70_s28, 2048  ;;  %p3468_p12 = scmp.lt.s32.totalorder %s70_s28, %s70_s28 }
  0x1c   :  { %p3464_p11 = scmp.ne.s32.totalorder %s70_s28, %s3463_s6  ;;  %p3469_p13 = scmp.lt.s32.totalorder %s3463_s6, %s3463_s6 }
  0x1e   :  { %p3470_p0 = por %p3469_p13, %p3468_p12 }
  0x20   :  { %p3471_p1 = pnand %p3470_p0, %p3464_p11 }
  0x22   :  { %3474 = shalt.err (!%p3471_p1)
}
  0x23   :  { %s3552_s14 = smov 128   ;;  %s3553_s19 = smov 8  }
  0x24   :  { %75 = dma.hbm_to_vmem [thread:$0]  %s4364_s8, 2048, %s70_s28, [#allocation8], %s3552_s14, %s3552_s14, %s3553_s19  }
  0x25   :  { %s3475_s24 = scalar_lea.hbm %s4359_s3, 768 }
  0x26   :  { %p3476_p2 = scmp.ne.s32.totalorder %s4359_s3, %s3475_s24  ;;  %p3479_p3 = scmp.lt.u32.totalorder %s3475_s24, %s4359_s3 }
  0x28   :  { %p3481_p4 = pnand %p3479_p3, %p3476_p2 }
  0x2a   :  { %3484 = shalt.err (!%p3481_p4)
}
  0x2b   :  { %s3485_s11 = scalar_lea.vmem %s30_s30, 768  ;;  %p3490_p6 = scmp.lt.s32.totalorder %s30_s30, %s30_s30 }
  0x2c   :  { %p3486_p5 = scmp.ne.s32.totalorder %s30_s30, %s3485_s11  ;;  %p3491_p7 = scmp.lt.s32.totalorder %s3485_s11, %s3485_s11 }
  0x2e   :  { %p3492_p8 = por %p3491_p7, %p3490_p6 }
  0x30   :  { %p3493_p9 = pnand %p3492_p8, %p3486_p5 }
  0x32   :  { %3496 = shalt.err (!%p3493_p9)
}
  0x33   :  { %s3554_s8 = smov 384   ;;  %s3555_s28 = smov 24  }
  0x34   :  { %35 = dma.hbm_to_vmem [thread:$0]  %s4359_s3, 768, %s30_s30, [#allocation3], %s3554_s8, %s3554_s8, %s3555_s28  }
  0x35   :  { %s3556_s15 = smov [#allocation6]   ;;  %s3557_s17 = smov [#allocation9]  }
  0x36   :  { %s57_s16 = sshll.u32 %s3556_s15, 4  ;;  %s82_s18 = sshll.u32 %s3557_s17, 4  ;;  %s58_s16 = int_to_ptr.vmem [resolvable:$true] %s57_s16  ;;  %s83_s18 = int_to_ptr.vmem [resolvable:$true] %s82_s18 }
  0x37   :  { %s3497_s21 = scalar_lea.hbm %s4363_s7, 2048 }
  0x38   :  { %p3498_p10 = scmp.ne.s32.totalorder %s4363_s7, %s3497_s21  ;;  %p3501_p11 = scmp.lt.u32.totalorder %s3497_s21, %s4363_s7 }
  0x3a   :  { %p3503_p12 = pnand %p3501_p11, %p3498_p10 }
  0x3c   :  { %3506 = shalt.err (!%p3503_p12)
}
  0x3d   :  { %s3507_s3 = scalar_lea.vmem %s58_s16, 2048  ;;  %p3512_p0 = scmp.lt.s32.totalorder %s58_s16, %s58_s16 }
  0x3e   :  { %p3508_p13 = scmp.ne.s32.totalorder %s58_s16, %s3507_s3  ;;  %p3513_p1 = scmp.lt.s32.totalorder %s3507_s3, %s3507_s3 }
  0x40   :  { %p3514_p2 = por %p3513_p1, %p3512_p0 }
  0x42   :  { %p3515_p3 = pnand %p3514_p2, %p3508_p13 }
  0x44   :  { %3518 = shalt.err (!%p3515_p3)
}
  0x45   :  { %63 = dma.hbm_to_vmem [thread:$0]  %s4363_s7, 2048, %s58_s16, [#allocation5], %s3552_s14, %s3552_s14, %s3553_s19  }
  0x46   :  { %s3519_s11 = scalar_lea.hbm %s4365_s9, 16 }
  0x47   :  { %p3520_p4 = scmp.ne.s32.totalorder %s4365_s9, %s3519_s11  ;;  %p3523_p5 = scmp.lt.u32.totalorder %s3519_s11, %s4365_s9 }
  0x49   :  { %p3525_p6 = pnand %p3523_p5, %p3520_p4 }
  0x4b   :  { %3528 = shalt.err (!%p3525_p6)
}
  0x4c   :  { %s3529_s15 = scalar_lea.vmem %s83_s18, 16  ;;  %s3533_s17 = scalar_lea.vmem %s83_s18, 32 }
  0x4d   :  { %p3530_p7 = scmp.ne.s32.totalorder %s83_s18, %s3529_s15  ;;  %p3534_p8 = scmp.lt.s32.totalorder %s83_s18, %s83_s18 }
  0x4e   :  { %p3535_p9 = scmp.lt.s32.totalorder %s3533_s17, %s3529_s15 }
  0x50   :  { %p3536_p10 = por %p3535_p9, %p3534_p8 }
  0x52   :  { %p3537_p11 = pnand %p3536_p10, %p3530_p7 }
  0x54   :  { %3540 = shalt.err (!%p3537_p11)
}
  0x55   :  { %85 = dma.hbm_to_vmem [thread:$0]  %s4365_s9, 16, %s83_s18, [#allocation8]  }
  0x56   :  { %3541 = dma.done.wait [#allocation3], 768  }
  0x57   :  { %3542 = vsyncadd [#allocation3], 4294966528 }
  0x58   :  { %3543 = dma.done.wait [#allocation5], 10240  }
  0x59   :  { %3544 = vsyncadd [#allocation5], 4294957056 }
  0x5a   :  { %3545 = dma.done.wait [#allocation8], 2064  }
  0x5b   :  { %3546 = vsyncadd [#allocation8], 4294965232  ;;  %v3558_v0 = vmov 0.0   ;;  %v3559_v1 = vmov 0   ;;  %v110_v2 = vld [vmem:[#allocation2 + $0x8] sm:$0xff]  ;;  %v113_v3 = vld [vmem:[#allocation2 + $0x20] sm:$0xff] }
  0x5c   :  { %221 = vmatprep.mubr.f32.mxu0 %v3558_v0  ;;  %3341 = vset.pattern.permute.xlu0 %v3559_v1  ;;  %v109_v4 = vld [vmem:[#allocation2] sm:$0xff]  ;;  %v2723_v5 = vpack.c.bf16 %v113_v3, %v110_v2  ;;  %v112_v6 = vld [vmem:[#allocation2 + $0x18] sm:$0xff]  ;;  %vm132_vm0 = vcmask 130048   ;;  %v376_v8 = vld [vmem:[%s4361_s5 + $0x8] sm:$0xff]  ;;  %v3560_v48 = vmov 0.0|0.0   ;;  %vm3561_vm2 = vmmov 0  }
  0x5d   :  { %3342 = vset.pattern.permute.xlu1 %v3559_v1  ;;  %v101_v7 = vld [vmem:[%s4357_s1] sm:$0xff]  ;;  %v2725_v9 = vpack.c.bf16 %v112_v6, %v109_v4  ;;  %v378_v12 = vld [vmem:[%s4361_s5 + $0x18] sm:$0xff]  ;;  %v385_v15 = vld [vmem:[%s4361_s5 + $0x50] sm:$0xff]  ;;  %s3564_s27 = smov 1  }
  0x5e   :  { %v379_v10 = vld [vmem:[%s4361_s5 + $0x20] sm:$0xff]  ;;  %2361 = vmatprep.mubr.msk.f32.mxu1 %vm132_vm0, %v101_v7  ;;  %2724 = vmatprep.subr.bf16.mxu0 %v2723_v5  ;;  %v382_v14 = vld [vmem:[%s4361_s5 + $0x38] sm:$0xff]  ;;  %v381_v18 = vld [vmem:[%s4361_s5 + $0x30] sm:$0xff] }
  0x5f   :  { %v375_v11 = vld [vmem:[%s4361_s5] sm:$0xff]  ;;  %v3705_v13 = vpack.c.bf16 %v379_v10, %v376_v8  ;;  %2726 = vmatpush1.bf16.msra.mxu0 %v2725_v9  ;;  %v3716_v17 = vpack.c.bf16 %v385_v15, %v382_v14  ;;  %v384_v19 = vld [vmem:[%s4361_s5 + $0x48] sm:$0xff]  ;;  %v390_v26 = vld [vmem:[%s4361_s5 + $0x78] sm:$0xff] }
  0x60   :  { %v3713_v16 = vpack.c.bf16 %v378_v12, %v375_v11  ;;  %v388_v20 = vld [vmem:[%s4361_s5 + $0x68] sm:$0xff]  ;;  %v391_v21 = vld [vmem:[%s4361_s5 + $0x80] sm:$0xff]  ;;  %v3736_v23 = vpack.c.bf16 %v384_v19, %v381_v18  ;;  %v394_v27 = vld [vmem:[%s4361_s5 + $0x98] sm:$0xff]  ;;  %v117_v12 = vlaneseq }
  0x61   :  { %2732 = vmatprep.subr.bf16.mxu0 %v3705_v13  ;;  %v102_v22 = vld [vmem:[%s4357_s1 + $0x8] sm:$0xff]  ;;  %v3739_v24 = vpack.c.bf16 %v391_v21, %v388_v20  ;;  %v387_v25 = vld [vmem:[%s4361_s5 + $0x60] sm:$0xff]  ;;  %v397_v28 = vld [vmem:[%s4361_s5 + $0xb0] sm:$0xff] }
  0x62   :  { %2141 = vmatmul.mubr.msk.f32.vlgmr.msra.gmra.mrb[0].mxu0 %vm132_vm0, %v101_v7  ;;  %v103_v29 = vld [vmem:[%s4357_s1 + $0x10] sm:$0xff]  ;;  %v3759_v30 = vpack.c.bf16 %v390_v26, %v387_v25  ;;  %v114_v32 = vld [vmem:[#allocation2 + $0x28] sm:$0xff]  ;;  %v3762_v33 = vpack.c.bf16 %v397_v28, %v394_v27  ;;  %v403_v38 = vld [vmem:[%s4361_s5 + $0xe0] sm:$0xff]  ;;  %v3928_v27 = vand.u32 127, %v117_v12 }
  0x63   :  { %2734 = vmatpush1.bf16.msra.mxu0 %v3713_v16  ;;  %227 = vmatprep.mubr.f32.mxu0 %v3558_v0  ;;  %v111_v31 = vld [vmem:[#allocation2 + $0x10] sm:$0xff]  ;;  %v396_v35 = vld [vmem:[%s4361_s5 + $0xa8] sm:$0xff]  ;;  %v104_v41 = vld [vmem:[%s4357_s1 + $0x18] sm:$0xff] }
  0x64   :  { %2736 = vmatprep.subr.bf16.mxu0 %v3716_v17  ;;  %v393_v34 = vld [vmem:[%s4361_s5 + $0x90] sm:$0xff]  ;;  %v2727_v36 = vpack.c.bf16 %v114_v32, %v111_v31  ;;  %v400_v37 = vld [vmem:[%s4361_s5 + $0xc8] sm:$0xff]  ;;  %v399_v44 = vld [vmem:[%s4361_s5 + $0xc0] sm:$0xff]  ;;  %vm426_vm4 = vcmp.eq.s32.totalorder %v3928_v27, 32 }
  0x65   :  { %v377_v39 = vld [vmem:[%s4361_s5 + $0x10] sm:$0xff]  ;;  %v380_v40 = vld [vmem:[%s4361_s5 + $0x28] sm:$0xff]  ;;  %v3788_v42 = vpack.c.bf16 %v396_v35, %v393_v34  ;;  %v3791_v43 = vpack.c.bf16 %v403_v38, %v400_v37  ;;  %v402_v45 = vld [vmem:[%s4361_s5 + $0xd8] sm:$0xff] }
  0x66   :  { %2142 = vmatmul.mubr.msk.f32.gmra.mrb[2].mxu0 %vm132_vm0, %v102_v22  ;;  %2728 = vmatprep.subr.bf16.mxu1 %v2727_v36  ;;  %v406_v46 = vld [vmem:[%s4361_s5 + $0xf8] sm:$0xff]  ;;  %v409_v47 = vld [vmem:[%s4361_s5 + $0x110] sm:$0xff]  ;;  %v3806_v49 = vpack.c.bf16 %v380_v40, %v377_v39  ;;  %v383_v50 = vld [vmem:[%s4361_s5 + $0x40] sm:$0xff]  ;;  %v3820_v53 = vpack.c.bf16 %v402_v45, %v399_v44 }
  0x67   :  { %2738 = vmatpush1.bf16.msra.mxu0 %v3736_v23  ;;  %233 = vmatprep.mubr.f32.mxu0 %v3558_v0  ;;  %v386_v51 = vld [vmem:[%s4361_s5 + $0x58] sm:$0xff]  ;;  %v105_v52 = vld [vmem:[%s4357_s1 + $0x20] sm:$0xff]  ;;  %v3823_v54 = vpack.c.bf16 %v409_v47, %v406_v46  ;;  %v405_v55 = vld [vmem:[%s4361_s5 + $0xf0] sm:$0xff]  ;;  %v118_v47 = vshrl.u32 %v117_v12, 7 }
  0x68   :  { %2740 = vmatprep.subr.bf16.mxu0 %v3739_v24  ;;  %2730 = vmatpush3.bf16.msra.mxu1 %v2727_v36  ;;  %v408_v56 = vld [vmem:[%s4361_s5 + $0x108] sm:$0xff]  ;;  %v415_v58 = vld [vmem:[%s4361_s5 + $0x140] sm:$0xff]  ;;  %v3839_v59 = vpack.c.bf16 %v386_v51, %v383_v50  ;;  %v389_v60 = vld [vmem:[%s4361_s5 + $0x70] sm:$0xff]  ;;  %v3562_v36 = vmov 1.0  }
  0x69   :  { %2763 = vmatprep.subr.bf16.mxu1 %v3560_v48  ;;  %v412_v57 = vld [vmem:[%s4361_s5 + $0x128] sm:$0xff]  ;;  %v3855_v63 = vpack.c.bf16 %v408_v56, %v405_v55  ;;  %v411_v3 = vld [vmem:[%s4361_s5 + $0x120] sm:$0xff]  ;;  %v414_v4 = vld [vmem:[%s4361_s5 + $0x138] sm:$0xff]  ;;  %v127_v50 = vsub.s32 2, %v118_v47 }
  0x6a   :  { %2143 = vmatmul.mubr.msk.f32.gmra.mrb[4].mxu0 %vm132_vm0, %v103_v29  ;;  %v392_v61 = vld [vmem:[%s4361_s5 + $0x88] sm:$0xff]  ;;  %v3858_v2 = vpack.c.bf16 %v415_v58, %v412_v57  ;;  %v418_v5 = vld [vmem:[%s4361_s5 + $0x158] sm:$0xff]  ;;  %v421_v6 = vld [vmem:[%s4361_s5 + $0x170] sm:$0xff]  ;;  %v3890_v11 = vpack.c.bf16 %v414_v4, %v411_v3 }
  0x6b   :  { %2742 = vmatpush1.bf16.msra.mxu0 %v3759_v30  ;;  %239 = vmatprep.mubr.f32.mxu0 %v3558_v0  ;;  %v106_v62 = vld [vmem:[%s4357_s1 + $0x28] sm:$0xff]  ;;  %v3874_v7 = vpack.c.bf16 %v392_v61, %v389_v60  ;;  %v395_v8 = vld [vmem:[%s4361_s5 + $0xa0] sm:$0xff]  ;;  %v398_v9 = vld [vmem:[%s4361_s5 + $0xb8] sm:$0xff]  ;;  %v3898_v15 = vpack.c.bf16 %v421_v6, %v418_v5 }
  0x6c   :  { %2744 = vmatprep.subr.bf16.mxu0 %v3762_v33  ;;  %2362 = vmatmul.mubr.msk.f32.vlgmr.msra.gmra.mrb[0].mxu1 %vm132_vm0, %v102_v22  ;;  %v107_v10 = vld [vmem:[%s4357_s1 + $0x30] sm:$0xff]  ;;  %v3895_v14 = vld [vmem:[%s4358_s2] sm:$0xff]  ;;  %v420_v19 = vld [vmem:[%s4361_s5 + $0x168] sm:$0xff]  ;;  %v3908_v20 = vpack.c.bf16 %v398_v9, %v395_v8  ;;  %v123_v9 = vsub.s32 1, %v118_v47 }
  0x6d   :  { %2765 = vmatpush3.bf16.msra.mxu1 %v3806_v49  ;;  %2364 = vmatprep.mubr.msk.f32.mxu1 %vm132_vm0, %v103_v29  ;;  %v417_v18 = vld [vmem:[%s4361_s5 + $0x150] sm:$0xff]  ;;  %v404_v22 = vld [vmem:[%s4361_s5 + $0xe8] sm:$0xff]  ;;  %vm590_vm1 = vcmp.gt.s32.totalorder %v3895_v14, 0  ;;  %v108_v25 = vld [vmem:[%s4357_s1 + $0x38] sm:$0xff]  ;;  %vm759_vm3 = vcmp.gt.s32.totalorder %v3895_v14, 1  ;;  %vm1266_vm5 = vcmp.gt.s32.totalorder %v3895_v14, 4 }
  0x6e   :  { %2144 = vmatmul.mubr.msk.f32.gmra.mrb[6].mxu0 %vm132_vm0, %v104_v41  ;;  %2766 = vmatprep.subr.bf16.mxu1 %v3560_v48  ;;  %v401_v21 = vld [vmem:[%s4361_s5 + $0xd0] sm:$0xff]  ;;  %v3925_v26 = vpack.c.bf16 %v420_v19, %v417_v18  ;;  %v591_v29 = vsel %vm590_vm1, 1, %v3559_v1  ;;  %v407_v31 = vld [vmem:[%s4361_s5 + $0x100] sm:$0xff]  ;;  %v410_v32 = vld [vmem:[%s4361_s5 + $0x118] sm:$0xff]  ;;  %v760_v35 = vsel %vm759_vm3, 1, %v3559_v1  ;;  %v1267_v40 = vsel %vm1266_vm5, 1, %v3559_v1 }
  0x6f   :  { %2746 = vmatpush1.bf16.msra.mxu0 %v3788_v42  ;;  %245 = vmatprep.mubr.f32.mxu0 %v3558_v0  ;;  %v3933_v28 = vpack.c.bf16 %v404_v22, %v401_v21  ;;  %v3952_v34 = vpack.c.bf16 %v410_v32, %v407_v31  ;;  %v413_v37 = vld [vmem:[%s4361_s5 + $0x130] sm:$0xff]  ;;  %v416_v38 = vld [vmem:[%s4361_s5 + $0x148] sm:$0xff]  ;;  %v422_v44 = vld [vmem:[%s4361_s5 + $0x178] sm:$0xff]  ;;  %vm1604_vm6 = vcmp.gt.s32.totalorder %v3895_v14, 6  ;;  %v119_v21 = vsub.s32 0, %v118_v47 }
  0x70   :  { %2748 = vmatprep.subr.bf16.mxu0 %v3791_v43  ;;  %2365 = vmatmul.mubr.msk.f32.gmra.mrb[2].mxu1 %vm132_vm0, %v104_v41  ;;  %v3969_v39 = vpack.c.bf16 %v416_v38, %v413_v37  ;;  %v419_v41 = vld [vmem:[%s4361_s5 + $0x160] sm:$0xff]  ;;  %v1605_v46 = vsel %vm1604_vm6, 1, %v3559_v1  ;;  %vm928_vm8 = vcmp.gt.s32.totalorder %v3895_v14, 2  ;;  %vm1097_vm9 = vcmp.gt.s32.totalorder %v3895_v14, 3 }
  0x71   :  { %2768 = vmatpush3.bf16.msra.mxu1 %v3839_v59  ;;  %2367 = vmatprep.mubr.msk.f32.mxu1 %vm132_vm0, %v105_v52  ;;  %v3983_v45 = vpack.c.bf16 %v422_v44, %v419_v41  ;;  %v115_v51 = vld [vmem:[%s4360_s4] sm:$0x7]  ;;  %vm1435_vm10 = vcmp.gt.s32.totalorder %v3895_v14, 5  ;;  %vm1773_vm11 = vcmp.gt.s32.totalorder %v3895_v14, 7 }
  0x72   :  { %2145 = vmatmul.mubr.msk.f32.gmra.mrb[8].mxu0 %vm132_vm0, %v105_v52  ;;  %2769 = vmatprep.subr.bf16.mxu1 %v3560_v48  ;;  %v128_v52 = vrot.slane %v115_v51, %v127_v50  ;;  %v4039_v22 = vrot.slane %v115_v51, %v123_v9 }
  0x73   :  { %2750 = vmatpush1.bf16.msra.mxu0 %v3820_v53  ;;  %251 = vmatprep.mubr.f32.mxu0 %v3558_v0 }
  0x74   :  { %2752 = vmatprep.subr.bf16.mxu0 %v3823_v54  ;;  %2368 = vmatmul.mubr.msk.f32.gmra.mrb[4].mxu1 %vm132_vm0, %v106_v62 }
  0x75   :  { %2771 = vmatpush3.bf16.msra.mxu1 %v3874_v7  ;;  %2370 = vmatprep.mubr.msk.f32.mxu1 %vm132_vm0, %v107_v10 }
  0x76   :  { %2146 = vmatmul.mubr.msk.f32.gmra.mrb[10].mxu0 %vm132_vm0, %v106_v62  ;;  %2772 = vmatprep.subr.bf16.mxu1 %v3560_v48 }
  0x77   :  { %2754 = vmatpush1.bf16.msra.mxu0 %v3855_v63  ;;  %257 = vmatprep.mubr.f32.mxu0 %v3558_v0 }
  0x78   :  { %2756 = vmatprep.subr.bf16.mxu0 %v3858_v2  ;;  %2371 = vmatmul.mubr.msk.f32.gmra.mrb[6].mxu1 %vm132_vm0, %v108_v25 }
  0x79   :  { %2774 = vmatpush3.bf16.msra.mxu1 %v3908_v20  ;;  %2405 = vmatprep.mubr.msk.f32.mxu1 %vm3561_vm2, %v3558_v0 }
  0x7a   :  { %2147 = vmatmul.mubr.msk.f32.gmra.mrb[12].mxu0 %vm132_vm0, %v107_v10  ;;  %2775 = vmatprep.subr.bf16.mxu1 %v3560_v48 }
  0x7b   :  { %2758 = vmatpush1.bf16.msra.mxu0 %v3890_v11  ;;  %263 = vmatprep.mubr.f32.mxu0 %v3558_v0 }
  0x7c   :  { %2760 = vmatprep.subr.bf16.mxu0 %v3898_v15  ;;  %593 = vperm.xlu0 %3341, %v591_v29   ;;  %v4041_v29 = vrot.slane %v115_v51, %v119_v21  ;;  %v1098_v21 = vsel %vm1097_vm9, 1, %v3559_v1 }
  0x7d   :  { %2777 = vmatpush3.bf16.msra.mxu1 %v3933_v28 }
  0x7e   :  { %2148 = vmatmul.mubr.msk.f32.gmra.mrb[14].mxu0 %vm132_vm0, %v108_v25  ;;  %2778 = vmatprep.subr.bf16.mxu1 %v3560_v48 }
  0x7f   :  { %2762 = vmatpush1.bf16.msra.mxu0 %v3925_v26  ;;  %492 = vmatprep.mubr.f32.mxu0 %v3558_v0 }
  0x80   :  { %2788 = vmatprep.subr.bf16.mxu0 %v3705_v13  ;;  %762 = vperm.xlu0 %3341, %v760_v35  }
  0x81   :  { %2780 = vmatpush3.bf16.msra.mxu1 %v3952_v34 }
  0x82   :  { %2157 = vmatmul.mubr.msk.f32.vlgmr.msra.gmra.mrb[0].mxu0 %vm426_vm4, %v3562_v36  ;;  %2781 = vmatprep.subr.bf16.mxu1 %v3560_v48 }
  0x83   :  { %2790 = vmatpush1.bf16.msra.mxu0 %v3713_v16  ;;  %661 = vmatprep.mubr.f32.mxu0 %v3558_v0 }
  0x84   :  { %2792 = vmatprep.subr.bf16.mxu0 %v3716_v17  ;;  %1269 = vperm.xlu0 %3341, %v1267_v40  }
  0x85   :  { %2783 = vmatpush3.bf16.msra.mxu1 %v3969_v39 }
  0x86   :  { %2784 = vmatprep.subr.bf16.mxu1 %v3560_v48 }
  0x87   :  { %2794 = vmatpush1.bf16.msra.mxu0 %v3736_v23 }
  0x88   :  { %2796 = vmatprep.subr.bf16.mxu0 %v3739_v24  ;;  %1607 = vperm.xlu0 %3341, %v1605_v46  }
  0x89   :  { %2786 = vmatpush3.bf16.msra.mxu1 %v3983_v45 }
  0x8a   :  { %2819 = vmatprep.subr.bf16.mxu1 %v3560_v48 }
  0x8b   :  { %2798 = vmatpush1.bf16.msra.mxu0 %v3759_v30 }
  0x8c   :  { %2800 = vmatprep.subr.bf16.mxu0 %v3762_v33  ;;  %2406 = vmatmul.mubr.msk.f32.vlgmr.msra.gmra.mrb[8].mxu1 %vm426_vm4, %v3562_v36 }
  0x8d   :  { %2821 = vmatpush3.bf16.msra.mxu1 %v3806_v49  ;;  %2440 = vmatprep.mubr.msk.f32.mxu1 %vm3561_vm2, %v3558_v0 }
  0x8e   :  { %2822 = vmatprep.subr.bf16.mxu1 %v3560_v48 }
  0x8f   :  { %2802 = vmatpush1.bf16.msra.mxu0 %v3788_v42 }
  0x90   :  { %2804 = vmatprep.subr.bf16.mxu0 %v3791_v43 }
  0x91   :  { %2824 = vmatpush3.bf16.msra.mxu1 %v3839_v59 }
  0x92   :  { %2825 = vmatprep.subr.bf16.mxu1 %v3560_v48 }
  0x93   :  { %2806 = vmatpush1.bf16.msra.mxu0 %v3820_v53 }
  0x94   :  { %2808 = vmatprep.subr.bf16.mxu0 %v3823_v54 }
  0x95   :  { %2827 = vmatpush3.bf16.msra.mxu1 %v3874_v7 }
  0x96   :  { %2828 = vmatprep.subr.bf16.mxu1 %v3560_v48 }
  0x97   :  { %2810 = vmatpush1.bf16.msra.mxu0 %v3855_v63 }
  0x98   :  { %2812 = vmatprep.subr.bf16.mxu0 %v3858_v2 }
  0x99   :  { %2830 = vmatpush3.bf16.msra.mxu1 %v3908_v20 }
  0x9a   :  { %2831 = vmatprep.subr.bf16.mxu1 %v3560_v48 }
  0x9b   :  { %2814 = vmatpush1.bf16.msra.mxu0 %v3890_v11 }
  0x9c   :  { %2816 = vmatprep.subr.bf16.mxu0 %v3898_v15 }
  0x9d   :  { %2833 = vmatpush3.bf16.msra.mxu1 %v3933_v28 }
  0x9e   :  { %2834 = vmatprep.subr.bf16.mxu1 %v3560_v48 }
  0x9f   :  { %2818 = vmatpush1.bf16.msra.mxu0 %v3925_v26 }
  0xa0   :  { %2844 = vmatprep.subr.bf16.mxu0 %v3705_v13 }
  0xa1   :  { %2836 = vmatpush3.bf16.msra.mxu1 %v3952_v34 }
  0xa2   :  { %2837 = vmatprep.subr.bf16.mxu1 %v3560_v48 }
  0xa5   :  { %2839 = vmatpush3.bf16.msra.mxu1 %v3969_v39 }
  0xa6   :  { %2840 = vmatprep.subr.bf16.mxu1 %v3560_v48 }
  0xa9   :  { %2842 = vmatpush3.bf16.msra.mxu1 %v3983_v45 }
  0xaa   :  { %2875 = vmatprep.subr.bf16.mxu1 %v3560_v48 }
 0x13f   :  { %v2363_v55 = vpop.f32.mrb[0].mxu1 }
 0x140   :  { %v4025_v56 = vadd.f32 %v2363_v55, %v128_v52  ;;  %v336_v57 = vpop.f32.mrb[1].mxu1 }
 0x141   :  { %v337_v58 = vadd.f32 %v336_v57, %v128_v52  ;;  %v427_v57 = vsel %vm426_vm4, 1.0, %v3558_v0  ;;  %vm2122_vm4 = vcmp.lt.s32.totalorder %v3928_v27, 12 }
 0x143   :  { %v2366_v60 = vpop.f32.mrb[2].mxu1 }
 0x144   :  { %v4027_v61 = vadd.f32 %v2366_v60, %v128_v52  ;;  %v346_v62 = vpop.f32.mrb[3].mxu1 }
 0x145   :  { %v4029_v3 = vadd.f32 %v346_v62, %v128_v52 }
 0x147   :  { %v2369_v4 = vpop.f32.mrb[4].mxu1 }
 0x148   :  { %v4031_v5 = vadd.f32 %v2369_v4, %v128_v52  ;;  %v356_v6 = vpop.f32.mrb[5].mxu1  ;;  %v594_v4 = vpop.permute.xlu0 %593 }
 0x149   :  { %v4033_v8 = vadd.f32 %v356_v6, %v128_v52  ;;  %vm595_vm7 = vcmp.eq.s32.totalorder %v594_v4, 1 }
 0x14b   :  { %v2372_v10 = vpop.f32.mrb[6].mxu1 }
 0x14c   :  { %v4035_v12 = vadd.f32 %v2372_v10, %v128_v52  ;;  %v366_v18 = vpop.f32.mrb[7].mxu1 }
 0x14d   :  { %v4037_v19 = vadd.f32 %v366_v18, %v128_v52 }
 0x155   :  { %v494_v25 = vpop.f32.mrb[0].mxu0 }
 0x156   :  { %v496_v31 = vpop.f32.mrb[1].mxu0  ;;  %v3291_v36 = vadd.f32 %v494_v25, %v4041_v29  ;;  %v1436_v25 = vsel %vm1435_vm10, 1, %v3559_v1 }
 0x157   :  { %v3292_v32 = vadd.f32 %v496_v31, %v4039_v22  ;;  %v1774_v31 = vsel %vm1773_vm11, 1, %v3559_v1 }
 0x158   :  { %v2159_v37 = vmul.f32 -1.442695, %v3291_v36 }
 0x159   :  { %v2160_v35 = vmul.f32 -1.442695, %v3292_v32 }
 0x15b   :  { %3343 = vpow2.f32 %v2160_v35 }
 0x15c   :  { %3345 = vpow2.f32 %v2159_v37 }
 0x15f   :  { %v565_v38 = vpop.f32.mrb[8].mxu1 }
 0x160   :  { %v2407_v40 = vpop.f32.mrb[9].mxu1 }
 0x165   :  { %v3344_v41 = vpop.eup %3343 }
 0x166   :  { %v580_v44 = vadd.f32 1.0, %v3344_v41  ;;  %v3346_v46 = vpop.eup %3345 }
 0x167   :  { %v573_v47 = vadd.f32 1.0, %v3346_v46 }
 0x168   :  { %3347 = vrcp.f32 %v580_v44 }
 0x169   :  { %3349 = vrcp.f32 %v573_v47 }
 0x172   :  { %v3348_v50 = vpop.eup %3347 }
 0x173   :  { %v583_v51 = vmul.f32 %v3348_v50, %v565_v38  ;;  %v3350_v55 = vpop.eup %3349 }
 0x174   :  { %v586_v60 = vsub.f32 1.0, %v3350_v55  ;;  %v588_v9 = vmul.f32 %v3350_v55, %v427_v57 }
 0x175   :  { %v584_v52 = vadd.f32 %v583_v51, %v337_v58  ;;  %v929_v58 = vsel %vm928_vm8, 1, %v3559_v1 }
 0x176   :  { %931 = vperm.xlu1 %3342, %v929_v58  }
 0x177   :  { %3351 = vtanh.f32 %v584_v52 }
 0x17a   :  { %1100 = vperm.xlu1 %3342, %v1098_v21  }
 0x17e   :  { %1438 = vperm.xlu1 %3342, %v1436_v25  }
 0x181   :  { %v3352_v62 = vpop.eup %3351 }
 0x182   :  { %v587_v6 = vmul.f32 %v3352_v62, %v586_v60  ;;  %1776 = vperm.xlu1 %3342, %v1774_v31  }
 0x184   :  { %v589_v10 = vadd.f32 %v588_v9, %v587_v6  ;;  %v763_v6 = vpop.permute.xlu0 %762 }
 0x185   :  { %vm764_vm12 = vcmp.eq.s32.totalorder %v763_v6, 1 }
 0x186   :  { %v4048_v18 = vsel %vm595_vm7, %v589_v10, %v427_v57 }
 0x187   :  { %662 = vmatmul.mubr.f32.vlgmr.msra.gmra.mrb[2].mxu0 %v4048_v18  ;;  %2441 = vmatmul.mubr.f32.vlgmr.msra.gmra.mrb[10].mxu1 %v4048_v18 }
 0x188   :  { %2846 = vmatpush1.bf16.msra.mxu0 %v3713_v16  ;;  %2877 = vmatpush3.bf16.msra.mxu1 %v3806_v49 }
 0x189   :  { %2848 = vmatprep.subr.bf16.mxu0 %v3716_v17  ;;  %2878 = vmatprep.subr.bf16.mxu1 %v3560_v48 }
 0x18a   :  { %830 = vmatprep.mubr.f32.mxu0 %v3558_v0  ;;  %2475 = vmatprep.mubr.msk.f32.mxu1 %vm3561_vm2, %v3558_v0 }
 0x18c   :  { %2850 = vmatpush1.bf16.msra.mxu0 %v3736_v23  ;;  %2880 = vmatpush3.bf16.msra.mxu1 %v3839_v59 }
 0x18d   :  { %2852 = vmatprep.subr.bf16.mxu0 %v3739_v24  ;;  %2881 = vmatprep.subr.bf16.mxu1 %v3560_v48 }
 0x190   :  { %2854 = vmatpush1.bf16.msra.mxu0 %v3759_v30  ;;  %2883 = vmatpush3.bf16.msra.mxu1 %v3874_v7 }
 0x191   :  { %2856 = vmatprep.subr.bf16.mxu0 %v3762_v33  ;;  %2884 = vmatprep.subr.bf16.mxu1 %v3560_v48 }
 0x194   :  { %2858 = vmatpush1.bf16.msra.mxu0 %v3788_v42  ;;  %2886 = vmatpush3.bf16.msra.mxu1 %v3908_v20 }
 0x195   :  { %2860 = vmatprep.subr.bf16.mxu0 %v3791_v43  ;;  %2887 = vmatprep.subr.bf16.mxu1 %v3560_v48 }
 0x198   :  { %2862 = vmatpush1.bf16.msra.mxu0 %v3820_v53  ;;  %2889 = vmatpush3.bf16.msra.mxu1 %v3933_v28 }
 0x199   :  { %2864 = vmatprep.subr.bf16.mxu0 %v3823_v54  ;;  %2890 = vmatprep.subr.bf16.mxu1 %v3560_v48 }
 0x19c   :  { %2866 = vmatpush1.bf16.msra.mxu0 %v3855_v63  ;;  %2892 = vmatpush3.bf16.msra.mxu1 %v3952_v34 }
 0x19d   :  { %2868 = vmatprep.subr.bf16.mxu0 %v3858_v2  ;;  %2893 = vmatprep.subr.bf16.mxu1 %v3560_v48 }
 0x1a0   :  { %2870 = vmatpush1.bf16.msra.mxu0 %v3890_v11  ;;  %2895 = vmatpush3.bf16.msra.mxu1 %v3969_v39 }
 0x1a1   :  { %2872 = vmatprep.subr.bf16.mxu0 %v3898_v15  ;;  %2896 = vmatprep.subr.bf16.mxu1 %v3560_v48 }
 0x1a4   :  { %2874 = vmatpush1.bf16.msra.mxu0 %v3925_v26  ;;  %2898 = vmatpush3.bf16.msra.mxu1 %v3983_v45 }
 0x1a5   :  { %2900 = vmatprep.subr.bf16.mxu0 %v3705_v13  ;;  %2931 = vmatprep.subr.bf16.mxu1 %v3560_v48 }
 0x25a   :  { %v663_v32 = vpop.f32.mrb[2].mxu0  ;;  %v734_v35 = vpop.f32.mrb[10].mxu1 }
 0x25b   :  { %v665_v36 = vpop.f32.mrb[3].mxu0  ;;  %v2442_v37 = vpop.f32.mrb[11].mxu1  ;;  %v3293_v41 = vadd.f32 %v663_v32, %v4041_v29 }
 0x25c   :  { %v3294_v38 = vadd.f32 %v665_v36, %v4039_v22 }
 0x25d   :  { %v2161_v44 = vmul.f32 -1.442695, %v3293_v41 }
 0x25e   :  { %v2162_v40 = vmul.f32 -1.442695, %v3294_v38 }
 0x260   :  { %3353 = vpow2.f32 %v2162_v40 }
 0x261   :  { %3355 = vpow2.f32 %v2161_v44 }
 0x26a   :  { %v3354_v46 = vpop.eup %3353 }
 0x26b   :  { %v749_v47 = vadd.f32 1.0, %v3354_v46  ;;  %v3356_v14 = vpop.eup %3355 }
 0x26c   :  { %v742_v50 = vadd.f32 1.0, %v3356_v14 }
 0x26d   :  { %3357 = vrcp.f32 %v749_v47 }
 0x26e   :  { %3359 = vrcp.f32 %v742_v50 }
 0x277   :  { %v3358_v51 = vpop.eup %3357 }
 0x278   :  { %v752_v1 = vmul.f32 %v3358_v51, %v734_v35  ;;  %v3360_v55 = vpop.eup %3359  ;;  %v932_v51 = vpop.permute.xlu1 %931 }
 0x279   :  { %v755_v57 = vsub.f32 1.0, %v3360_v55  ;;  %v757_v4 = vmul.f32 %v3360_v55, %v4048_v18  ;;  %vm933_vm13 = vcmp.eq.s32.totalorder %v932_v51, 1 }
 0x27a   :  { %v753_v52 = vadd.f32 %v752_v1, %v4025_v56 }
 0x27c   :  { %3361 = vtanh.f32 %v753_v52 }
 0x286   :  { %v3362_v60 = vpop.eup %3361 }
 0x287   :  { %v756_v62 = vmul.f32 %v3362_v60, %v755_v57 }
 0x289   :  { %v758_v9 = vadd.f32 %v757_v4, %v756_v62 }
 0x28b   :  { %v4100_v10 = vsel %vm764_vm12, %v758_v9, %v4048_v18 }
 0x28c   :  { %831 = vmatmul.mubr.f32.vlgmr.msra.gmra.mrb[4].mxu0 %v4100_v10  ;;  %2476 = vmatmul.mubr.f32.vlgmr.msra.gmra.mrb[12].mxu1 %v4100_v10 }
 0x28d   :  { %2902 = vmatpush1.bf16.msra.mxu0 %v3713_v16  ;;  %2933 = vmatpush3.bf16.msra.mxu1 %v3806_v49 }
 0x28e   :  { %2904 = vmatprep.subr.bf16.mxu0 %v3716_v17  ;;  %2934 = vmatprep.subr.bf16.mxu1 %v3560_v48 }
 0x28f   :  { %999 = vmatprep.mubr.f32.mxu0 %v3558_v0  ;;  %2510 = vmatprep.mubr.msk.f32.mxu1 %vm3561_vm2, %v3558_v0 }
 0x291   :  { %2906 = vmatpush1.bf16.msra.mxu0 %v3736_v23  ;;  %2936 = vmatpush3.bf16.msra.mxu1 %v3839_v59 }
 0x292   :  { %2908 = vmatprep.subr.bf16.mxu0 %v3739_v24  ;;  %2937 = vmatprep.subr.bf16.mxu1 %v3560_v48 }
 0x295   :  { %2910 = vmatpush1.bf16.msra.mxu0 %v3759_v30  ;;  %2939 = vmatpush3.bf16.msra.mxu1 %v3874_v7 }
 0x296   :  { %2912 = vmatprep.subr.bf16.mxu0 %v3762_v33  ;;  %2940 = vmatprep.subr.bf16.mxu1 %v3560_v48 }
 0x299   :  { %2914 = vmatpush1.bf16.msra.mxu0 %v3788_v42  ;;  %2942 = vmatpush3.bf16.msra.mxu1 %v3908_v20 }
 0x29a   :  { %2916 = vmatprep.subr.bf16.mxu0 %v3791_v43  ;;  %2943 = vmatprep.subr.bf16.mxu1 %v3560_v48 }
 0x29d   :  { %2918 = vmatpush1.bf16.msra.mxu0 %v3820_v53  ;;  %2945 = vmatpush3.bf16.msra.mxu1 %v3933_v28 }
 0x29e   :  { %2920 = vmatprep.subr.bf16.mxu0 %v3823_v54  ;;  %2946 = vmatprep.subr.bf16.mxu1 %v3560_v48 }
 0x2a1   :  { %2922 = vmatpush1.bf16.msra.mxu0 %v3855_v63  ;;  %2948 = vmatpush3.bf16.msra.mxu1 %v3952_v34 }
 0x2a2   :  { %2924 = vmatprep.subr.bf16.mxu0 %v3858_v2  ;;  %2949 = vmatprep.subr.bf16.mxu1 %v3560_v48 }
 0x2a5   :  { %2926 = vmatpush1.bf16.msra.mxu0 %v3890_v11  ;;  %2951 = vmatpush3.bf16.msra.mxu1 %v3969_v39 }
 0x2a6   :  { %2928 = vmatprep.subr.bf16.mxu0 %v3898_v15  ;;  %2952 = vmatprep.subr.bf16.mxu1 %v3560_v48 }
 0x2a9   :  { %2930 = vmatpush1.bf16.msra.mxu0 %v3925_v26  ;;  %2954 = vmatpush3.bf16.msra.mxu1 %v3983_v45 }
 0x2aa   :  { %2956 = vmatprep.subr.bf16.mxu0 %v3705_v13  ;;  %2987 = vmatprep.subr.bf16.mxu1 %v3560_v48 }
 0x35f   :  { %v832_v56 = vpop.f32.mrb[4].mxu0  ;;  %v903_v18 = vpop.f32.mrb[12].mxu1 }
 0x360   :  { %v834_v58 = vpop.f32.mrb[5].mxu0  ;;  %v2477_v21 = vpop.f32.mrb[13].mxu1  ;;  %v3295_v32 = vadd.f32 %v832_v56, %v4041_v29 }
 0x361   :  { %v3296_v25 = vadd.f32 %v834_v58, %v4039_v22 }
 0x362   :  { %v2163_v35 = vmul.f32 -1.442695, %v3295_v32 }
 0x363   :  { %v2164_v31 = vmul.f32 -1.442695, %v3296_v25 }
 0x365   :  { %3363 = vpow2.f32 %v2164_v31 }
 0x366   :  { %3365 = vpow2.f32 %v2163_v35 }
 0x36f   :  { %v3364_v36 = vpop.eup %3363 }
 0x370   :  { %v918_v37 = vadd.f32 1.0, %v3364_v36  ;;  %v3366_v38 = vpop.eup %3365 }
 0x371   :  { %v911_v40 = vadd.f32 1.0, %v3366_v38 }
 0x372   :  { %3367 = vrcp.f32 %v918_v37 }
 0x373   :  { %3369 = vrcp.f32 %v911_v40 }
 0x37c   :  { %v3368_v41 = vpop.eup %3367 }
 0x37d   :  { %v921_v44 = vmul.f32 %v3368_v41, %v903_v18  ;;  %v3370_v47 = vpop.eup %3369 }
 0x37e   :  { %v924_v14 = vsub.f32 1.0, %v3370_v47  ;;  %v926_v52 = vmul.f32 %v3370_v47, %v4100_v10 }
 0x37f   :  { %v922_v46 = vadd.f32 %v921_v44, %v4029_v3  ;;  %v1101_v44 = vpop.permute.xlu1 %1100 }
 0x380   :  { %vm1102_vm14 = vcmp.eq.s32.totalorder %v1101_v44, 1 }
 0x381   :  { %3371 = vtanh.f32 %v922_v46 }
 0x38b   :  { %v3372_v50 = vpop.eup %3371 }
 0x38c   :  { %v925_v1 = vmul.f32 %v3372_v50, %v924_v14 }
 0x38e   :  { %v927_v55 = vadd.f32 %v926_v52, %v925_v1 }
 0x390   :  { %v4144_v57 = vsel %vm933_vm13, %v927_v55, %v4100_v10 }
 0x391   :  { %1000 = vmatmul.mubr.f32.vlgmr.msra.gmra.mrb[6].mxu0 %v4144_v57  ;;  %2511 = vmatmul.mubr.f32.vlgmr.msra.gmra.mrb[14].mxu1 %v4144_v57 }
 0x392   :  { %2958 = vmatpush1.bf16.msra.mxu0 %v3713_v16  ;;  %2989 = vmatpush3.bf16.msra.mxu1 %v3806_v49 }
 0x393   :  { %2960 = vmatprep.subr.bf16.mxu0 %v3716_v17  ;;  %2990 = vmatprep.subr.bf16.mxu1 %v3560_v48 }
 0x394   :  { %1168 = vmatprep.mubr.f32.mxu0 %v3558_v0  ;;  %2545 = vmatprep.mubr.msk.f32.mxu1 %vm3561_vm2, %v3558_v0 }
 0x396   :  { %2962 = vmatpush1.bf16.msra.mxu0 %v3736_v23  ;;  %2992 = vmatpush3.bf16.msra.mxu1 %v3839_v59 }
 0x397   :  { %2964 = vmatprep.subr.bf16.mxu0 %v3739_v24  ;;  %2993 = vmatprep.subr.bf16.mxu1 %v3560_v48 }
 0x39a   :  { %2966 = vmatpush1.bf16.msra.mxu0 %v3759_v30  ;;  %2995 = vmatpush3.bf16.msra.mxu1 %v3874_v7 }
 0x39b   :  { %2968 = vmatprep.subr.bf16.mxu0 %v3762_v33  ;;  %2996 = vmatprep.subr.bf16.mxu1 %v3560_v48 }
 0x39e   :  { %2970 = vmatpush1.bf16.msra.mxu0 %v3788_v42  ;;  %2998 = vmatpush3.bf16.msra.mxu1 %v3908_v20 }
 0x39f   :  { %2972 = vmatprep.subr.bf16.mxu0 %v3791_v43  ;;  %2999 = vmatprep.subr.bf16.mxu1 %v3560_v48 }
 0x3a2   :  { %2974 = vmatpush1.bf16.msra.mxu0 %v3820_v53  ;;  %3001 = vmatpush3.bf16.msra.mxu1 %v3933_v28 }
 0x3a3   :  { %2976 = vmatprep.subr.bf16.mxu0 %v3823_v54  ;;  %3002 = vmatprep.subr.bf16.mxu1 %v3560_v48 }
 0x3a6   :  { %2978 = vmatpush1.bf16.msra.mxu0 %v3855_v63  ;;  %3004 = vmatpush3.bf16.msra.mxu1 %v3952_v34 }
 0x3a7   :  { %2980 = vmatprep.subr.bf16.mxu0 %v3858_v2  ;;  %3005 = vmatprep.subr.bf16.mxu1 %v3560_v48 }
 0x3aa   :  { %2982 = vmatpush1.bf16.msra.mxu0 %v3890_v11  ;;  %3007 = vmatpush3.bf16.msra.mxu1 %v3969_v39 }
 0x3ab   :  { %2984 = vmatprep.subr.bf16.mxu0 %v3898_v15  ;;  %3008 = vmatprep.subr.bf16.mxu1 %v3560_v48 }
 0x3ae   :  { %2986 = vmatpush1.bf16.msra.mxu0 %v3925_v26  ;;  %3010 = vmatpush3.bf16.msra.mxu1 %v3983_v45 }
 0x3af   :  { %3012 = vmatprep.subr.bf16.mxu0 %v3705_v13  ;;  %3043 = vmatprep.subr.bf16.mxu1 %v3560_v48 }
 0x464   :  { %v1001_v3 = vpop.f32.mrb[6].mxu0  ;;  %v1072_v60 = vpop.f32.mrb[14].mxu1 }
 0x465   :  { %v1003_v62 = vpop.f32.mrb[7].mxu0  ;;  %v2512_v4 = vpop.f32.mrb[15].mxu1  ;;  %v3297_v10 = vadd.f32 %v1001_v3, %v4041_v29 }
 0x466   :  { %v3298_v6 = vadd.f32 %v1003_v62, %v4039_v22 }
 0x467   :  { %v2165_v56 = vmul.f32 -1.442695, %v3297_v10 }
 0x468   :  { %v2166_v9 = vmul.f32 -1.442695, %v3298_v6 }
 0x46a   :  { %3373 = vpow2.f32 %v2166_v9 }
 0x46b   :  { %3375 = vpow2.f32 %v2165_v56 }
 0x474   :  { %v3374_v18 = vpop.eup %3373 }
 0x475   :  { %v1087_v58 = vadd.f32 1.0, %v3374_v18  ;;  %v3376_v21 = vpop.eup %3375 }
 0x476   :  { %v1080_v25 = vadd.f32 1.0, %v3376_v21 }
 0x477   :  { %3377 = vrcp.f32 %v1087_v58 }
 0x478   :  { %3379 = vrcp.f32 %v1080_v25 }
 0x481   :  { %v3378_v31 = vpop.eup %3377 }
 0x482   :  { %v1090_v32 = vmul.f32 %v3378_v31, %v1072_v60  ;;  %v3380_v36 = vpop.eup %3379  ;;  %v1270_v31 = vpop.permute.xlu0 %1269 }
 0x483   :  { %v1093_v37 = vsub.f32 1.0, %v3380_v36  ;;  %v1095_v41 = vmul.f32 %v3380_v36, %v4144_v57  ;;  %vm1271_vm15 = vcmp.eq.s32.totalorder %v1270_v31, 1  ;;  %v1785_v31 = vld [vmem:[#allocation4 + $0x20] sm:$0xff] }
 0x484   :  { %v1091_v35 = vadd.f32 %v1090_v32, %v4027_v61 }
 0x486   :  { %3381 = vtanh.f32 %v1091_v35 }
 0x490   :  { %v3382_v38 = vpop.eup %3381 }
 0x491   :  { %v1094_v40 = vmul.f32 %v3382_v38, %v1093_v37 }
 0x493   :  { %v1096_v46 = vadd.f32 %v1095_v41, %v1094_v40 }
 0x495   :  { %v4188_v47 = vsel %vm1102_vm14, %v1096_v46, %v4144_v57 }
 0x496   :  { %1169 = vmatmul.mubr.f32.vlgmr.msra.gmra.mrb[8].mxu0 %v4188_v47  ;;  %2546 = vmatmul.mubr.f32.vlgmr.msra.gmra.mrb[16].mxu1 %v4188_v47 }
 0x497   :  { %3014 = vmatpush1.bf16.msra.mxu0 %v3713_v16  ;;  %3045 = vmatpush3.bf16.msra.mxu1 %v3806_v49 }
 0x498   :  { %3016 = vmatprep.subr.bf16.mxu0 %v3716_v17  ;;  %3046 = vmatprep.subr.bf16.mxu1 %v3560_v48 }
 0x499   :  { %1337 = vmatprep.mubr.f32.mxu0 %v3558_v0  ;;  %2580 = vmatprep.mubr.msk.f32.mxu1 %vm3561_vm2, %v3558_v0 }
 0x49b   :  { %3018 = vmatpush1.bf16.msra.mxu0 %v3736_v23  ;;  %3048 = vmatpush3.bf16.msra.mxu1 %v3839_v59 }
 0x49c   :  { %3020 = vmatprep.subr.bf16.mxu0 %v3739_v24  ;;  %3049 = vmatprep.subr.bf16.mxu1 %v3560_v48 }
 0x49f   :  { %3022 = vmatpush1.bf16.msra.mxu0 %v3759_v30  ;;  %3051 = vmatpush3.bf16.msra.mxu1 %v3874_v7 }
 0x4a0   :  { %3024 = vmatprep.subr.bf16.mxu0 %v3762_v33  ;;  %3052 = vmatprep.subr.bf16.mxu1 %v3560_v48 }
 0x4a3   :  { %3026 = vmatpush1.bf16.msra.mxu0 %v3788_v42  ;;  %3054 = vmatpush3.bf16.msra.mxu1 %v3908_v20 }
 0x4a4   :  { %3028 = vmatprep.subr.bf16.mxu0 %v3791_v43  ;;  %3055 = vmatprep.subr.bf16.mxu1 %v3560_v48 }
 0x4a7   :  { %3030 = vmatpush1.bf16.msra.mxu0 %v3820_v53  ;;  %3057 = vmatpush3.bf16.msra.mxu1 %v3933_v28 }
 0x4a8   :  { %3032 = vmatprep.subr.bf16.mxu0 %v3823_v54  ;;  %3058 = vmatprep.subr.bf16.mxu1 %v3560_v48 }
 0x4ab   :  { %3034 = vmatpush1.bf16.msra.mxu0 %v3855_v63  ;;  %3060 = vmatpush3.bf16.msra.mxu1 %v3952_v34 }
 0x4ac   :  { %3036 = vmatprep.subr.bf16.mxu0 %v3858_v2  ;;  %3061 = vmatprep.subr.bf16.mxu1 %v3560_v48 }
 0x4af   :  { %3038 = vmatpush1.bf16.msra.mxu0 %v3890_v11  ;;  %3063 = vmatpush3.bf16.msra.mxu1 %v3969_v39 }
 0x4b0   :  { %3040 = vmatprep.subr.bf16.mxu0 %v3898_v15  ;;  %3064 = vmatprep.subr.bf16.mxu1 %v3560_v48 }
 0x4b3   :  { %3042 = vmatpush1.bf16.msra.mxu0 %v3925_v26  ;;  %3066 = vmatpush3.bf16.msra.mxu1 %v3983_v45 }
 0x4b4   :  { %3068 = vmatprep.subr.bf16.mxu0 %v3705_v13  ;;  %3099 = vmatprep.subr.bf16.mxu1 %v3560_v48 }
 0x569   :  { %v1170_v61 = vpop.f32.mrb[8].mxu0  ;;  %v1241_v14 = vpop.f32.mrb[16].mxu1 }
 0x56a   :  { %v1172_v50 = vpop.f32.mrb[9].mxu0  ;;  %v2547_v51 = vpop.f32.mrb[17].mxu1  ;;  %v3299_v55 = vadd.f32 %v1170_v61, %v4041_v29 }
 0x56b   :  { %v3300_v1 = vadd.f32 %v1172_v50, %v4039_v22 }
 0x56c   :  { %v2167_v57 = vmul.f32 -1.442695, %v3299_v55 }
 0x56d   :  { %v2168_v52 = vmul.f32 -1.442695, %v3300_v1 }
 0x56f   :  { %3383 = vpow2.f32 %v2168_v52 }
 0x570   :  { %3385 = vpow2.f32 %v2167_v57 }
 0x579   :  { %v3384_v3 = vpop.eup %3383 }
 0x57a   :  { %v1256_v60 = vadd.f32 1.0, %v3384_v3  ;;  %v3386_v62 = vpop.eup %3385 }
 0x57b   :  { %v1249_v4 = vadd.f32 1.0, %v3386_v62  ;;  %v1439_v62 = vpop.permute.xlu1 %1438 }
 0x57c   :  { %3387 = vrcp.f32 %v1256_v60  ;;  %vm1440_vm0 = vcmp.eq.s32.totalorder %v1439_v62, 1 }
 0x57d   :  { %3389 = vrcp.f32 %v1249_v4 }
 0x586   :  { %v3388_v6 = vpop.eup %3387 }
 0x587   :  { %v1259_v9 = vmul.f32 %v3388_v6, %v1241_v14  ;;  %v3390_v56 = vpop.eup %3389 }
 0x588   :  { %v1262_v18 = vsub.f32 1.0, %v3390_v56  ;;  %v1264_v25 = vmul.f32 %v3390_v56, %v4188_v47  ;;  %v1786_v56 = vld [vmem:[#allocation4 + $0x28] sm:$0xff] }
 0x589   :  { %v1260_v10 = vadd.f32 %v1259_v9, %v4033_v8 }
 0x58b   :  { %3391 = vtanh.f32 %v1260_v10 }
 0x595   :  { %v3392_v58 = vpop.eup %3391 }
 0x596   :  { %v1263_v21 = vmul.f32 %v3392_v58, %v1262_v18  ;;  %v1788_v18 = vld [vmem:[#allocation4 + $0x38] sm:$0xff] }
 0x598   :  { %v1265_v32 = vadd.f32 %v1264_v25, %v1263_v21  ;;  %v3183_v25 = vpack.c.bf16 %v1788_v18, %v1786_v56  ;;  %v1824_v56 = vld [vmem:[#allocation4 + $0x158] sm:$0xff] }
 0x59a   :  { %v4232_v35 = vsel %vm1271_vm15, %v1265_v32, %v4188_v47  ;;  %v1787_v32 = vld [vmem:[#allocation4 + $0x30] sm:$0xff] }
 0x59b   :  { %1338 = vmatmul.mubr.f32.vlgmr.msra.gmra.mrb[10].mxu0 %v4232_v35  ;;  %2581 = vmatmul.mubr.f32.vlgmr.msra.gmra.mrb[18].mxu1 %v4232_v35 }
 0x59c   :  { %3070 = vmatpush1.bf16.msra.mxu0 %v3713_v16  ;;  %3101 = vmatpush3.bf16.msra.mxu1 %v3806_v49 }
 0x59d   :  { %3072 = vmatprep.subr.bf16.mxu0 %v3716_v17  ;;  %3102 = vmatprep.subr.bf16.mxu1 %v3560_v48 }
 0x59e   :  { %1506 = vmatprep.mubr.f32.mxu0 %v3558_v0  ;;  %2615 = vmatprep.mubr.msk.f32.mxu1 %vm3561_vm2, %v3558_v0 }
 0x5a0   :  { %3074 = vmatpush1.bf16.msra.mxu0 %v3736_v23  ;;  %3104 = vmatpush3.bf16.msra.mxu1 %v3839_v59 }
 0x5a1   :  { %3076 = vmatprep.subr.bf16.mxu0 %v3739_v24  ;;  %3105 = vmatprep.subr.bf16.mxu1 %v3560_v48 }
 0x5a4   :  { %3078 = vmatpush1.bf16.msra.mxu0 %v3759_v30  ;;  %3107 = vmatpush3.bf16.msra.mxu1 %v3874_v7 }
 0x5a5   :  { %3080 = vmatprep.subr.bf16.mxu0 %v3762_v33  ;;  %3108 = vmatprep.subr.bf16.mxu1 %v3560_v48 }
 0x5a8   :  { %3082 = vmatpush1.bf16.msra.mxu0 %v3788_v42  ;;  %3110 = vmatpush3.bf16.msra.mxu1 %v3908_v20 }
 0x5a9   :  { %3084 = vmatprep.subr.bf16.mxu0 %v3791_v43  ;;  %3111 = vmatprep.subr.bf16.mxu1 %v3560_v48 }
 0x5ac   :  { %3086 = vmatpush1.bf16.msra.mxu0 %v3820_v53  ;;  %3113 = vmatpush3.bf16.msra.mxu1 %v3933_v28 }
 0x5ad   :  { %3088 = vmatprep.subr.bf16.mxu0 %v3823_v54  ;;  %3114 = vmatprep.subr.bf16.mxu1 %v3560_v48 }
 0x5b0   :  { %3090 = vmatpush1.bf16.msra.mxu0 %v3855_v63  ;;  %3116 = vmatpush3.bf16.msra.mxu1 %v3952_v34 }
 0x5b1   :  { %3092 = vmatprep.subr.bf16.mxu0 %v3858_v2  ;;  %3117 = vmatprep.subr.bf16.mxu1 %v3560_v48 }
 0x5b4   :  { %3094 = vmatpush1.bf16.msra.mxu0 %v3890_v11  ;;  %3119 = vmatpush3.bf16.msra.mxu1 %v3969_v39 }
 0x5b5   :  { %3096 = vmatprep.subr.bf16.mxu0 %v3898_v15  ;;  %3120 = vmatprep.subr.bf16.mxu1 %v3560_v48 }
 0x5b8   :  { %3098 = vmatpush1.bf16.msra.mxu0 %v3925_v26  ;;  %3122 = vmatpush3.bf16.msra.mxu1 %v3983_v45 }
 0x5b9   :  { %3124 = vmatprep.subr.bf16.mxu0 %v3705_v13  ;;  %3155 = vmatprep.subr.bf16.mxu1 %v3560_v48 }
 0x66e   :  { %v1339_v8 = vpop.f32.mrb[10].mxu0  ;;  %v1410_v36 = vpop.f32.mrb[18].mxu1 }
 0x66f   :  { %v1341_v37 = vpop.f32.mrb[11].mxu0  ;;  %v2582_v38 = vpop.f32.mrb[19].mxu1  ;;  %v3301_v44 = vadd.f32 %v1339_v8, %v4041_v29  ;;  %v1792_v8 = vld [vmem:[#allocation4 + $0x58] sm:$0xff] }
 0x670   :  { %v3302_v40 = vadd.f32 %v1341_v37, %v4039_v22  ;;  %v1789_v38 = vld [vmem:[#allocation4 + $0x40] sm:$0xff] }
 0x671   :  { %v2169_v46 = vmul.f32 -1.442695, %v3301_v44  ;;  %v1796_v44 = vld [vmem:[#allocation4 + $0x78] sm:$0xff] }
 0x672   :  { %v2170_v41 = vmul.f32 -1.442695, %v3302_v40  ;;  %v1791_v40 = vld [vmem:[#allocation4 + $0x50] sm:$0xff] }
 0x674   :  { %3393 = vpow2.f32 %v2170_v41  ;;  %v1794_v41 = vld [vmem:[#allocation4 + $0x68] sm:$0xff] }
 0x675   :  { %3395 = vpow2.f32 %v2169_v46  ;;  %v3189_v46 = vpack.c.bf16 %v1791_v40, %v1789_v38  ;;  %v1830_v38 = vld [vmem:[#allocation4 + $0x188] sm:$0xff]  ;;  %v1832_v40 = vld [vmem:[#allocation4 + $0x198] sm:$0xff] }
 0x67e   :  { %v3394_v47 = vpop.eup %3393 }
 0x67f   :  { %v1425_v61 = vadd.f32 1.0, %v3394_v47  ;;  %v3396_v14 = vpop.eup %3395  ;;  %v3191_v47 = vpack.c.bf16 %v1796_v44, %v1794_v41  ;;  %v3227_v41 = vpack.c.bf16 %v1832_v40, %v1830_v38  ;;  %v1829_v44 = vld [vmem:[#allocation4 + $0x180] sm:$0xff] }
 0x680   :  { %v1418_v50 = vadd.f32 1.0, %v3396_v14  ;;  %v1795_v14 = vld [vmem:[#allocation4 + $0x70] sm:$0xff] }
 0x681   :  { %3397 = vrcp.f32 %v1425_v61  ;;  %v1793_v61 = vld [vmem:[#allocation4 + $0x60] sm:$0xff] }
 0x682   :  { %3399 = vrcp.f32 %v1418_v50  ;;  %v3193_v50 = vpack.c.bf16 %v1795_v14, %v1793_v61  ;;  %v1834_v61 = vld [vmem:[#allocation4 + $0x1a8] sm:$0xff]  ;;  %v1836_v14 = vld [vmem:[#allocation4 + $0x1b8] sm:$0xff] }
 0x68b   :  { %v3398_v13 = vpop.eup %3397 }
 0x68c   :  { %v1428_v51 = vmul.f32 %v3398_v13, %v1410_v36  ;;  %v3400_v52 = vpop.eup %3399  ;;  %v3185_v36 = vpack.c.bf16 %v1787_v32, %v1785_v31  ;;  %v1798_v13 = vld [vmem:[#allocation4 + $0x88] sm:$0xff]  ;;  %v1828_v32 = vld [vmem:[#allocation4 + $0x178] sm:$0xff] }
 0x68d   :  { %v1431_v55 = vsub.f32 1.0, %v3400_v52  ;;  %v1433_v60 = vmul.f32 %v3400_v52, %v4232_v35  ;;  %v1797_v52 = vld [vmem:[#allocation4 + $0x80] sm:$0xff]  ;;  %v1826_v31 = vld [vmem:[#allocation4 + $0x168] sm:$0xff] }
 0x68e   :  { %v1429_v1 = vadd.f32 %v1428_v51, %v4031_v5  ;;  %v1608_v5 = vpop.permute.xlu0 %1607  ;;  %v1800_v51 = vld [vmem:[#allocation4 + $0x98] sm:$0xff] }
 0x68f   :  { %vm1609_vm1 = vcmp.eq.s32.totalorder %v1608_v5, 1  ;;  %v1819_v5 = vld [vmem:[#allocation4 + $0x130] sm:$0xff] }
 0x690   :  { %3401 = vtanh.f32 %v1429_v1  ;;  %v3195_v1 = vpack.c.bf16 %v1800_v51, %v1798_v13  ;;  %v3231_v13 = vpack.c.bf16 %v1836_v14, %v1834_v61  ;;  %v1835_v51 = vld [vmem:[#allocation4 + $0x1b0] sm:$0xff] }
 0x69a   :  { %v3402_v57 = vpop.eup %3401 }
 0x69b   :  { %v1432_v3 = vmul.f32 %v3402_v57, %v1431_v55  ;;  %v1799_v55 = vld [vmem:[#allocation4 + $0x90] sm:$0xff] }
 0x69c   :  { %v3197_v57 = vpack.c.bf16 %v1799_v55, %v1797_v52  ;;  %v1840_v52 = vld [vmem:[#allocation4 + $0x1d8] sm:$0xff] }
 0x69d   :  { %v1434_v4 = vadd.f32 %v1433_v60, %v1432_v3  ;;  %v1802_v3 = vld [vmem:[#allocation4 + $0xa8] sm:$0xff]  ;;  %v1804_v60 = vld [vmem:[#allocation4 + $0xb8] sm:$0xff] }
 0x69e   :  { %v3199_v62 = vpack.c.bf16 %v1804_v60, %v1802_v3  ;;  %v1837_v3 = vld [vmem:[#allocation4 + $0x1c0] sm:$0xff]  ;;  %v1839_v60 = vld [vmem:[#allocation4 + $0x1d0] sm:$0xff] }
 0x69f   :  { %v4276_v6 = vsel %vm1440_vm0, %v1434_v4, %v4232_v35  ;;  %v1790_v35 = vld [vmem:[#allocation4 + $0x48] sm:$0xff]  ;;  %v1801_v4 = vld [vmem:[#allocation4 + $0xa0] sm:$0xff] }
 0x6a0   :  { %1507 = vmatmul.mubr.f32.vlgmr.msra.gmra.mrb[12].mxu0 %v4276_v6  ;;  %2616 = vmatmul.mubr.f32.vlgmr.msra.gmra.mrb[20].mxu1 %v4276_v6  ;;  %v3187_v37 = vpack.c.bf16 %v1792_v8, %v1790_v35  ;;  %v3223_v35 = vpack.c.bf16 %v1828_v32, %v1826_v31  ;;  %v1825_v8 = vld [vmem:[#allocation4 + $0x160] sm:$0xff] }
 0x6a1   :  { %3126 = vmatpush1.bf16.msra.mxu0 %v3713_v16  ;;  %3157 = vmatpush3.bf16.msra.mxu1 %v3806_v49  ;;  %v1782_v16 = vld [vmem:[#allocation4 + $0x8] sm:$0xff] }
 0x6a2   :  { %3128 = vmatprep.subr.bf16.mxu0 %v3716_v17  ;;  %3158 = vmatprep.subr.bf16.mxu1 %v3560_v48  ;;  %v1784_v17 = vld [vmem:[#allocation4 + $0x18] sm:$0xff] }
 0x6a3   :  { %1675 = vmatprep.mubr.f32.mxu0 %v3558_v0  ;;  %2650 = vmatprep.mubr.msk.f32.mxu1 %vm3561_vm2, %v3558_v0 }
 0x6a5   :  { %3130 = vmatpush1.bf16.msra.mxu0 %v3736_v23  ;;  %3160 = vmatpush3.bf16.msra.mxu1 %v3839_v59  ;;  %v3179_v23 = vpack.c.bf16 %v1784_v17, %v1782_v16  ;;  %v1806_v17 = vld [vmem:[#allocation4 + $0xc8] sm:$0xff] }
 0x6a6   :  { %3132 = vmatprep.subr.bf16.mxu0 %v3739_v24  ;;  %3161 = vmatprep.subr.bf16.mxu1 %v3560_v48 }
 0x6a9   :  { %3134 = vmatpush1.bf16.msra.mxu0 %v3759_v30  ;;  %3163 = vmatpush3.bf16.msra.mxu1 %v3874_v7 }
 0x6aa   :  { %3136 = vmatprep.subr.bf16.mxu0 %v3762_v33  ;;  %3164 = vmatprep.subr.bf16.mxu1 %v3560_v48 }
 0x6ad   :  { %3138 = vmatpush1.bf16.msra.mxu0 %v3788_v42  ;;  %3166 = vmatpush3.bf16.msra.mxu1 %v3908_v20 }
 0x6ae   :  { %3140 = vmatprep.subr.bf16.mxu0 %v3791_v43  ;;  %3167 = vmatprep.subr.bf16.mxu1 %v3560_v48 }
 0x6b1   :  { %3142 = vmatpush1.bf16.msra.mxu0 %v3820_v53  ;;  %3169 = vmatpush3.bf16.msra.mxu1 %v3933_v28 }
 0x6b2   :  { %3144 = vmatprep.subr.bf16.mxu0 %v3823_v54  ;;  %3170 = vmatprep.subr.bf16.mxu1 %v3560_v48 }
 0x6b5   :  { %3146 = vmatpush1.bf16.msra.mxu0 %v3855_v63  ;;  %3172 = vmatpush3.bf16.msra.mxu1 %v3952_v34 }
 0x6b6   :  { %3148 = vmatprep.subr.bf16.mxu0 %v3858_v2  ;;  %3173 = vmatprep.subr.bf16.mxu1 %v3560_v48 }
 0x6b9   :  { %3150 = vmatpush1.bf16.msra.mxu0 %v3890_v11  ;;  %3175 = vmatpush3.bf16.msra.mxu1 %v3969_v39  ;;  %v1781_v39 = vld [vmem:[#allocation4] sm:$0xff] }
 0x6ba   :  { %3152 = vmatprep.subr.bf16.mxu0 %v3898_v15  ;;  %3176 = vmatprep.subr.bf16.mxu1 %v3560_v48 }
 0x6bd   :  { %3154 = vmatpush1.bf16.msra.mxu0 %v3925_v26  ;;  %3178 = vmatpush3.bf16.msra.mxu1 %v3983_v45  ;;  %v1783_v45 = vld [vmem:[#allocation4 + $0x10] sm:$0xff] }
 0x6be   :  { %3243 = vmatprep.subr.bf16.mxu1 %v3560_v48  ;;  %3180 = vmatprep.subr.bf16.mxu0 %v3179_v23  ;;  %v3181_v21 = vpack.c.bf16 %v1783_v45, %v1781_v39  ;;  %v1808_v23 = vld [vmem:[#allocation4 + $0xd8] sm:$0xff]  ;;  %v1817_v45 = vld [vmem:[#allocation4 + $0x120] sm:$0xff] }
 0x773   :  { %v1508_v24 = vpop.f32.mrb[12].mxu0  ;;  %v1579_v30 = vpop.f32.mrb[20].mxu1 }
 0x774   :  { %v1510_v33 = vpop.f32.mrb[13].mxu0  ;;  %v2617_v42 = vpop.f32.mrb[21].mxu1  ;;  %v3303_v53 = vadd.f32 %v1508_v24, %v4041_v29  ;;  %v3203_v24 = vpack.c.bf16 %v1808_v23, %v1806_v17  ;;  %v1841_v17 = vld [vmem:[#allocation4 + $0x1e0] sm:$0xff]  ;;  %v1843_v23 = vld [vmem:[#allocation4 + $0x1f0] sm:$0xff] }
 0x775   :  { %v3304_v43 = vadd.f32 %v1510_v33, %v4039_v22  ;;  %v1807_v33 = vld [vmem:[#allocation4 + $0xd0] sm:$0xff] }
 0x776   :  { %v2171_v54 = vmul.f32 -1.442695, %v3303_v53 }
 0x777   :  { %v2172_v49 = vmul.f32 -1.442695, %v3304_v43  ;;  %v1810_v43 = vld [vmem:[#allocation4 + $0xe8] sm:$0xff] }
 0x779   :  { %3403 = vpow2.f32 %v2172_v49  ;;  %v1812_v49 = vld [vmem:[#allocation4 + $0xf8] sm:$0xff] }
 0x77a   :  { %3405 = vpow2.f32 %v2171_v54  ;;  %v3207_v53 = vpack.c.bf16 %v1812_v49, %v1810_v43  ;;  %v1809_v54 = vld [vmem:[#allocation4 + $0xe0] sm:$0xff]  ;;  %v1920_v49 = vld [vmem:[#allocation6 + $0x18] sm:$0xff] }
 0x783   :  { %v3404_v59 = vpop.eup %3403 }
 0x784   :  { %v1594_v63 = vadd.f32 1.0, %v3404_v59  ;;  %v3406_v2 = vpop.eup %3405  ;;  %v1811_v59 = vld [vmem:[#allocation4 + $0xf0] sm:$0xff] }
 0x785   :  { %v1587_v7 = vadd.f32 1.0, %v3406_v2  ;;  %v1814_v2 = vld [vmem:[#allocation4 + $0x108] sm:$0xff] }
 0x786   :  { %3407 = vrcp.f32 %v1594_v63  ;;  %v3209_v63 = vpack.c.bf16 %v1811_v59, %v1809_v54  ;;  %v1921_v54 = vld [vmem:[#allocation6 + $0x20] sm:$0xff]  ;;  %v1922_v59 = vld [vmem:[#allocation6 + $0x28] sm:$0xff] }
 0x787   :  { %3409 = vrcp.f32 %v1587_v7  ;;  %v1816_v7 = vld [vmem:[#allocation4 + $0x118] sm:$0xff] }
 0x790   :  { %v3408_v11 = vpop.eup %3407 }
 0x791   :  { %v1597_v15 = vmul.f32 %v3408_v11, %v1579_v30  ;;  %v3410_v26 = vpop.eup %3409  ;;  %v1805_v30 = vld [vmem:[#allocation4 + $0xc0] sm:$0xff]  ;;  %v3211_v11 = vpack.c.bf16 %v1816_v7, %v1814_v2  ;;  %v1923_v2 = vld [vmem:[#allocation6 + $0x30] sm:$0xff]  ;;  %v1924_v7 = vld [vmem:[#allocation6 + $0x38] sm:$0xff] }
 0x792   :  { %v1600_v28 = vsub.f32 1.0, %v3410_v26  ;;  %v1602_v10 = vmul.f32 %v3410_v26, %v4276_v6  ;;  %v3205_v42 = vpack.c.bf16 %v1807_v33, %v1805_v30  ;;  %v1917_v30 = vld [vmem:[#allocation6] sm:$0xff]  ;;  %v1918_v33 = vld [vmem:[#allocation6 + $0x8] sm:$0xff] }
 0x793   :  { %v1598_v20 = vadd.f32 %v1597_v15, %v4037_v19  ;;  %v1813_v15 = vld [vmem:[#allocation4 + $0x100] sm:$0xff]  ;;  %v3244_v43 = vpack.c.bf16 %v1918_v33, %v1917_v30  ;;  %v2011_v30 = vld [vmem:[#allocation7 + $0x38] sm:$0xff] }
 0x795   :  { %3411 = vtanh.f32 %v1598_v20  ;;  %v1815_v20 = vld [vmem:[#allocation4 + $0x110] sm:$0xff] }
 0x796   :  { %v3213_v26 = vpack.c.bf16 %v1815_v20, %v1813_v15  ;;  %v1925_v15 = vld [vmem:[#allocation6 + $0x40] sm:$0xff]  ;;  %v1926_v20 = vld [vmem:[#allocation6 + $0x48] sm:$0xff] }
 0x79f   :  { %v3412_v34 = vpop.eup %3411 }
 0x7a0   :  { %v1601_v9 = vmul.f32 %v3412_v34, %v1600_v28  ;;  %v1818_v28 = vld [vmem:[#allocation4 + $0x128] sm:$0xff]  ;;  %v1820_v34 = vld [vmem:[#allocation4 + $0x138] sm:$0xff] }
 0x7a1   :  { %v3215_v39 = vpack.c.bf16 %v1820_v34, %v1818_v28  ;;  %v1927_v28 = vld [vmem:[#allocation6 + $0x50] sm:$0xff]  ;;  %v1928_v34 = vld [vmem:[#allocation6 + $0x58] sm:$0xff] }
 0x7a2   :  { %v1603_v58 = vadd.f32 %v1602_v10, %v1601_v9  ;;  %v3217_v9 = vpack.c.bf16 %v1819_v5, %v1817_v45  ;;  %v1822_v10 = vld [vmem:[#allocation4 + $0x148] sm:$0xff]  ;;  %v1929_v45 = vld [vmem:[#allocation6 + $0x60] sm:$0xff] }
 0x7a3   :  { %v3219_v18 = vpack.c.bf16 %v1824_v56, %v1822_v10  ;;  %v1930_v5 = vld [vmem:[#allocation6 + $0x68] sm:$0xff] }
 0x7a4   :  { %v4319_v19 = vsel %vm1609_vm1, %v1603_v58, %v4276_v6  ;;  %v1803_v6 = vld [vmem:[#allocation4 + $0xb0] sm:$0xff]  ;;  %v1821_v58 = vld [vmem:[#allocation4 + $0x140] sm:$0xff] }
 0x7a5   :  { %1676 = vmatmul.mubr.f32.vlgmr.msra.gmra.mrb[14].mxu0 %v4319_v19  ;;  %2651 = vmatmul.mubr.f32.vlgmr.msra.gmra.mrb[22].mxu1 %v4319_v19  ;;  %v3201_v16 = vpack.c.bf16 %v1803_v6, %v1801_v4  ;;  %v1844_v4 = vld [vmem:[#allocation4 + $0x1f8] sm:$0xff]  ;;  %v3237_v6 = vpack.c.bf16 %v1839_v60, %v1837_v3 }
 0x7a6   :  { %3182 = vmatpush1.bf16.msra.mxu0 %v3181_v21  ;;  %2685 = vmatprep.mubr.msk.f32.mxu1 %vm3561_vm2, %v3558_v0  ;;  %v1823_v21 = vld [vmem:[#allocation4 + $0x150] sm:$0xff] }
 0x7a7   :  { %3184 = vmatprep.subr.bf16.mxu0 %v3183_v25  ;;  %v3221_v25 = vpack.c.bf16 %v1823_v21, %v1821_v58  ;;  %3245 = vmatpush3.bf16.msra.mxu1 %v3244_v43  ;;  %v2013_v43 = vld [vmem:[#allocation7 + $0x48] sm:$0xff] }
 0x7a8   :  { %3246 = vmatprep.subr.bf16.mxu1 %v3560_v48 }
 0x7aa   :  { %3186 = vmatpush1.bf16.msra.mxu0 %v3185_v36  ;;  %v1827_v36 = vld [vmem:[#allocation4 + $0x170] sm:$0xff] }
 0x7ab   :  { %3188 = vmatprep.subr.bf16.mxu0 %v3187_v37  ;;  %v3225_v37 = vpack.c.bf16 %v1827_v36, %v1825_v8 }
 0x7ae   :  { %3190 = vmatpush1.bf16.msra.mxu0 %v3189_v46  ;;  %v1831_v46 = vld [vmem:[#allocation4 + $0x190] sm:$0xff] }
 0x7af   :  { %3192 = vmatprep.subr.bf16.mxu0 %v3191_v47  ;;  %v3229_v47 = vpack.c.bf16 %v1831_v46, %v1829_v44 }
 0x7b2   :  { %3194 = vmatpush1.bf16.msra.mxu0 %v3193_v50  ;;  %v1833_v50 = vld [vmem:[#allocation4 + $0x1a0] sm:$0xff] }
 0x7b3   :  { %3196 = vmatprep.subr.bf16.mxu0 %v3195_v1  ;;  %v1838_v1 = vld [vmem:[#allocation4 + $0x1c8] sm:$0xff]  ;;  %v3233_v55 = vpack.c.bf16 %v1835_v51, %v1833_v50  ;;  %v1780_v50 = vld [vmem:[%s4356_s0] sm:$0xff]  ;;  %s3563_s0 = smov 127  }
 0x7b4   :  { %v1931_v51 = vld [vmem:[#allocation6 + $0x70] sm:$0xff] }
 0x7b6   :  { %3198 = vmatpush1.bf16.msra.mxu0 %v3197_v57  ;;  %v3235_v57 = vpack.c.bf16 %v1840_v52, %v1838_v1  ;;  %v2004_v52 = vld [vmem:[#allocation7] sm:$0xff] }
 0x7b7   :  { %3200 = vmatprep.subr.bf16.mxu0 %v3199_v62  ;;  %v1842_v62 = vld [vmem:[#allocation4 + $0x1e8] sm:$0xff] }
 0x7ba   :  { %3202 = vmatpush1.bf16.msra.mxu0 %v3201_v16  ;;  %v3239_v16 = vpack.c.bf16 %v1844_v4, %v1842_v62  ;;  %v2006_v4 = vld [vmem:[#allocation7 + $0x10] sm:$0xff] }
 0x7bb   :  { %3204 = vmatprep.subr.bf16.mxu0 %v3203_v24  ;;  %v3241_v24 = vpack.c.bf16 %v1843_v23, %v1841_v17  ;;  %v2009_v17 = vld [vmem:[#allocation7 + $0x28] sm:$0xff] }
 0x7be   :  { %3206 = vmatpush1.bf16.msra.mxu0 %v3205_v42  ;;  %v1919_v42 = vld [vmem:[#allocation6 + $0x10] sm:$0xff] }
 0x7bf   :  { %3208 = vmatprep.subr.bf16.mxu0 %v3207_v53  ;;  %v3247_v53 = vpack.c.bf16 %v1920_v49, %v1919_v42  ;;  %v2012_v42 = vld [vmem:[#allocation7 + $0x40] sm:$0xff] }
 0x7c0   :  { %v3280_v49 = vpack.c.bf16 %v2013_v43, %v2012_v42 }
 0x7c1   :  { %3248 = vmatpush3.bf16.msra.mxu1 %v3247_v53  ;;  %v2014_v53 = vld [vmem:[#allocation7 + $0x50] sm:$0xff] }
 0x7c2   :  { %3210 = vmatpush1.bf16.msra.mxu0 %v3209_v63  ;;  %v3250_v63 = vpack.c.bf16 %v1922_v59, %v1921_v54  ;;  %3249 = vmatprep.subr.bf16.mxu1 %v3560_v48  ;;  %v2015_v54 = vld [vmem:[#allocation7 + $0x58] sm:$0xff] }
 0x7c3   :  { %3212 = vmatprep.subr.bf16.mxu0 %v3211_v11  ;;  %v3253_v11 = vpack.c.bf16 %v1924_v7, %v1923_v2  ;;  %v3283_v59 = vpack.c.bf16 %v2015_v54, %v2014_v53  ;;  %v2017_v2 = vld [vmem:[#allocation7 + $0x68] sm:$0xff] }
 0x7c5   :  { %3251 = vmatpush3.bf16.msra.mxu1 %v3250_v63  ;;  %v2016_v63 = vld [vmem:[#allocation7 + $0x60] sm:$0xff] }
 0x7c6   :  { %3214 = vmatpush1.bf16.msra.mxu0 %v3213_v26  ;;  %3252 = vmatprep.subr.bf16.mxu1 %v3560_v48  ;;  %v3256_v26 = vpack.c.bf16 %v1926_v20, %v1925_v15  ;;  %v3286_v7 = vpack.c.bf16 %v2017_v2, %v2016_v63  ;;  %v2019_v15 = vld [vmem:[#allocation7 + $0x78] sm:$0xff] }
 0x7c7   :  { %3216 = vmatprep.subr.bf16.mxu0 %v3215_v39  ;;  %v3259_v39 = vpack.c.bf16 %v1928_v34, %v1927_v28 }
 0x7c9   :  { %3254 = vmatpush3.bf16.msra.mxu1 %v3253_v11  ;;  %v2018_v11 = vld [vmem:[#allocation7 + $0x70] sm:$0xff] }
 0x7ca   :  { %3218 = vmatpush1.bf16.msra.mxu0 %v3217_v9  ;;  %3255 = vmatprep.subr.bf16.mxu1 %v3560_v48  ;;  %v3262_v9 = vpack.c.bf16 %v1930_v5, %v1929_v45  ;;  %v3289_v20 = vpack.c.bf16 %v2019_v15, %v2018_v11 }
 0x7cb   :  { %3220 = vmatprep.subr.bf16.mxu0 %v3219_v18 }
 0x7cd   :  { %3257 = vmatpush3.bf16.msra.mxu1 %v3256_v26 }
 0x7ce   :  { %3222 = vmatpush1.bf16.msra.mxu0 %v3221_v25  ;;  %3258 = vmatprep.subr.bf16.mxu1 %v3560_v48 }
 0x7cf   :  { %3224 = vmatprep.subr.bf16.mxu0 %v3223_v35 }
 0x7d1   :  { %3260 = vmatpush3.bf16.msra.mxu1 %v3259_v39  ;;  %v2175_v39 = vld [vmem:[#allocation9] ss:$0 sm:$0xff] }
 0x7d2   :  { %3226 = vmatpush1.bf16.msra.mxu0 %v3225_v37  ;;  %3261 = vmatprep.subr.bf16.mxu1 %v3560_v48 }
 0x7d3   :  { %3228 = vmatprep.subr.bf16.mxu0 %v3227_v41 }
 0x7d5   :  { %3263 = vmatpush3.bf16.msra.mxu1 %v3262_v9 }
 0x7d6   :  { %3230 = vmatpush1.bf16.msra.mxu0 %v3229_v47  ;;  %3264 = vmatprep.subr.bf16.mxu1 %v3560_v48  ;;  %v1777_v47 = vpop.permute.xlu1 %1776 }
 0x7d7   :  { %3232 = vmatprep.subr.bf16.mxu0 %v3231_v13  ;;  %vm1778_vm3 = vcmp.eq.s32.totalorder %v1777_v47, 1 }
 0x7da   :  { %3234 = vmatpush1.bf16.msra.mxu0 %v3233_v55  ;;  %v2005_v55 = vld [vmem:[#allocation7 + $0x8] sm:$0xff] }
 0x7db   :  { %3236 = vmatprep.subr.bf16.mxu0 %v3235_v57  ;;  %v3268_v60 = vpack.c.bf16 %v2005_v55, %v2004_v52 }
 0x7de   :  { %3238 = vmatpush1.bf16.msra.mxu0 %v3237_v6  ;;  %v2007_v6 = vld [vmem:[#allocation7 + $0x18] sm:$0xff] }
 0x7df   :  { %3240 = vmatprep.subr.bf16.mxu0 %v3239_v16  ;;  %v3271_v16 = vpack.c.bf16 %v2007_v6, %v2006_v4 }
 0x7e2   :  { %3242 = vmatpush1.bf16.msra.mxu0 %v3241_v24  ;;  %v2010_v24 = vld [vmem:[#allocation7 + $0x30] sm:$0xff] }
 0x7e3   :  { %v3277_v33 = vpack.c.bf16 %v2011_v30, %v2010_v24 }
 0x878   :  { %v1677_v10 = vpop.f32.mrb[14].mxu0  ;;  %v1748_v56 = vpop.f32.mrb[22].mxu1 }
 0x879   :  { %v1679_v18 = vpop.f32.mrb[15].mxu0  ;;  %v2652_v58 = vpop.f32.mrb[23].mxu1  ;;  %v3305_v31 = vadd.f32 %v1677_v10, %v4041_v29 }
 0x87a   :  { %v3306_v21 = vadd.f32 %v1679_v18, %v4039_v22 }
 0x87b   :  { %v2173_v32 = vmul.f32 -1.442695, %v3305_v31 }
 0x87c   :  { %v2174_v25 = vmul.f32 -1.442695, %v3306_v21 }
 0x87e   :  { %3413 = vpow2.f32 %v2174_v25 }
 0x87f   :  { %3415 = vpow2.f32 %v2173_v32 }
 0x888   :  { %v3414_v35 = vpop.eup %3413 }
 0x889   :  { %v1763_v8 = vadd.f32 1.0, %v3414_v35  ;;  %v3416_v36 = vpop.eup %3415 }
 0x88a   :  { %v1756_v37 = vadd.f32 1.0, %v3416_v36 }
 0x88b   :  { %3417 = vrcp.f32 %v1763_v8 }
 0x88c   :  { %3419 = vrcp.f32 %v1756_v37 }
 0x895   :  { %v3418_v38 = vpop.eup %3417 }
 0x896   :  { %v1766_v40 = vmul.f32 %v3418_v38, %v1748_v56  ;;  %v3420_v44 = vpop.eup %3419 }
 0x897   :  { %v1769_v46 = vsub.f32 1.0, %v3420_v44  ;;  %v1771_v29 = vmul.f32 %v3420_v44, %v4319_v19 }
 0x898   :  { %v1767_v41 = vadd.f32 %v1766_v40, %v4035_v12  ;;  %v1932_v12 = vld [vmem:[#allocation6 + $0x78] sm:$0xff] }
 0x899   :  { %v3265_v1 = vpack.c.bf16 %v1932_v12, %v1931_v51 }
 0x89a   :  { %3421 = vtanh.f32 %v1767_v41 }
 0x89b   :  { %3266 = vmatpush3.bf16.msra.mxu1 %v3265_v1 }
 0x89c   :  { %3267 = vmatprep.subr.bf16.mxu1 %v3560_v48 }
 0x8a4   :  { %v3422_v22 = vpop.eup %3421 }
 0x8a5   :  { %v1770_v61 = vmul.f32 %v3422_v22, %v1769_v46 }
 0x8a7   :  { %v1772_v14 = vadd.f32 %v1771_v29, %v1770_v61 }
 0x8a9   :  { %v1779_v13 = vsel %vm1778_vm3, %v1772_v14, %v4319_v19  ;;  %v2008_v19 = vld [vmem:[#allocation7 + $0x20] sm:$0xff] }
 0x8aa   :  { %1909 = vmatprep.mubr.f32.mxu0 %v1779_v13  ;;  %v3274_v23 = vpack.c.bf16 %v2009_v17, %v2008_v19 }
 0x8ab   :  { %1910 = vmatmul.mubr.f32.vlgmr.msra.gmra.mrb[16].mxu0 %v1780_v50 }
 0x97e   :  { %v1911_v57 = vpop.f32.mrb[16].mxu0 }
 0x97f   :  { %v1913_v3 = vpop.f32.mrb[17].mxu0 }
 0x980   :  { %v1916_v62 = vmul.f32 %v1913_v3, %v1911_v57 }
 0x982   :  { %2686 = vmatmul.mubr.f32.vlgmr.msra.gmra.mrb[24].mxu1 %v1916_v62 }
 0x983   :  { %3269 = vmatpush3.bf16.msra.mxu1 %v3268_v60  ;;  %2720 = vmatprep.mubr.msk.f32.mxu1 %vm3561_vm2, %v3558_v0  ;;  %vm2121_vm2 = vcmp.ge.s32.totalorder %v3928_v27, 10 }
 0x984   :  { %3270 = vmatprep.subr.bf16.mxu1 %v3560_v48  ;;  %vm2123_vm5 = vmand %vm2121_vm2, %vm2122_vm4 }
 0x985   :  { %v2176_v41 = vsel %vm2123_vm5, 1.0, %v3558_v0 }
 0x987   :  { %3272 = vmatpush3.bf16.msra.mxu1 %v3271_v16 }
 0x988   :  { %3273 = vmatprep.subr.bf16.mxu1 %v3560_v48 }
 0x98b   :  { %3275 = vmatpush3.bf16.msra.mxu1 %v3274_v23 }
 0x98c   :  { %3276 = vmatprep.subr.bf16.mxu1 %v3560_v48 }
 0x98f   :  { %3278 = vmatpush3.bf16.msra.mxu1 %v3277_v33 }
 0x990   :  { %3279 = vmatprep.subr.bf16.mxu1 %v3560_v48 }
 0x993   :  { %3281 = vmatpush3.bf16.msra.mxu1 %v3280_v49 }
 0x994   :  { %3282 = vmatprep.subr.bf16.mxu1 %v3560_v48 }
 0x997   :  { %3284 = vmatpush3.bf16.msra.mxu1 %v3283_v59 }
 0x998   :  { %3285 = vmatprep.subr.bf16.mxu1 %v3560_v48 }
 0x99b   :  { %3287 = vmatpush3.bf16.msra.mxu1 %v3286_v7 }
 0x99c   :  { %3288 = vmatprep.subr.bf16.mxu1 %v3560_v48 }
 0x99f   :  { %3290 = vmatpush3.bf16.msra.mxu1 %v3289_v20 }
 0xa55   :  { %v1999_v26 = vpop.f32.mrb[24].mxu1 }
 0xa56   :  { %3423 = vtanh.f32 %v1999_v26  ;;  %v2687_v28 = vpop.f32.mrb[25].mxu1 }
 0xa60   :  { %v3424_v34 = vpop.eup %3423 }
 0xa61   :  { %2721 = vmatmul.mubr.f32.vlgmr.msra.gmra.mrb[26].mxu1 %v3424_v34 }
 0xb34   :  { %v2093_v45 = vpop.f32.mrb[26].mxu1 }
 0xb35   :  { %v2094_v5 = vadd.f32 %v2175_v39, %v2093_v45  ;;  %v2722_v9 = vpop.f32.mrb[27].mxu1 }
 0xb37   :  { %v2097_v10 = vadd.f32 %v3424_v34, %v2094_v5 }
 0xb39   :  { %2099 = vrot.lane.b32.xlu0 %v2097_v10, %s3563_s0 }
 0xbab   :  { %v2100_v56 = vpop.permute.xlu0 %2099 }
 0xbac   :  { %v2102_v18 = vmax.f32 %v2097_v10, %v2100_v56 }
 0xbae   :  { %2107 = vrot.lane.b32.xlu1 %v2102_v18, %s3564_s27  ;;  %v2103_v31 = vsub.f32 %v2097_v10, %v2102_v18 }
 0xbb0   :  { %v2104_v32 = vmul.f32 1.442695, %v2103_v31 }
 0xc20   :  { %v2108_v58 = vpop.permute.xlu1 %2107 }
 0xc21   :  { %v2110_v21 = vsub.f32 %v2097_v10, %v2108_v58 }
 0xc23   :  { %v2111_v48 = vmul.f32 1.442695, %v2110_v21 }
 0xc25   :  { %3425 = vpow2.f32 %v2111_v48 }
 0xc26   :  { %3427 = vpow2.f32 %v2104_v32 }
 0xc2f   :  { %v3426_v25 = vpop.eup %3425 }
 0xc30   :  { %2114 = vrot.lane.b32.xlu0 %v3426_v25, %s3563_s0  ;;  %v3428_v35 = vpop.eup %3427 }
 0xca2   :  { %v2115_v8 = vpop.permute.xlu0 %2114 }
 0xca3   :  { %v2117_v36 = vadd.f32 %v3428_v35, %v2115_v8 }
 0xca5   :  { %3429 = vlog2.f32 %v2117_v36 }
 0xcaf   :  { %v3430_v37 = vpop.eup %3429 }
 0xcb0   :  { %v2119_v38 = vmul.f32 0.6931472, %v3430_v37 }
 0xcb2   :  { %v2120_v40 = vadd.f32 %v2119_v38, %v2102_v18 }
 0xcb4   :  { %2128 = vperm.xlu1 %3342, %v2120_v40  }
 0xd33   :  { %v2129_v44 = vpop.permute.xlu1 %2128 }
 0xd34   :  { %v2131_v46 = vmul.f32 %v2176_v41, %v2129_v44 }
 0xd36   :  { %v2132_v22 = vsub.f32 %v2097_v10, %v2131_v46 }
 0xd38   :  { %2133 = vst [vmem:[%s4366_s10] sm:$0xff] %v2132_v22 }
 0xd39   :  { %2138 = vsyncpa [#allocation3], 1 }
 0xd3a   :  { %2139 = vsyncpa [#allocation5], 1 }
 0xd3b   :  { %2140 = vsyncpa [#allocation8], 1 }

</bundles_post_ra>
